<compile_context>
chip_gen: v5e
topology: v5e:2x2
jax: 0.10.0
libtpu: 0.0.40
codegen_flags: <defaults>
</compile_context>

<pallas_src>
import functools
import math

import jax
import jax.numpy as jnp
from jax import lax
from jax.experimental import pallas as pl
from jax.experimental.pallas import tpu as pltpu


# ------------------------------- fused kernel -------------------------------


def _resnext_block_kernel(x_ref, w1_ref, b1_ref, w2_ref, b2_ref, w3_ref,
                          b3_ref, o_ref, xpad_ref, *, H, W, DC):
    """Fused ResNeXt bottleneck for one image (all intermediates in VMEM).

    x_ref   : (H, W, Cin)     input image, f32 (residual source)
    w1_ref  : (Cin, DC)       1x1 reduce weight, BN1 scale folded in
    b1_ref  : (1, DC)         BN1 bias, f32
    w2_ref  : (9, DC, DC)     grouped 3x3 conv as block-diagonal per-tap mats
                              (tap = ky*3 + kx), BN2 scale folded in
    b2_ref  : (1, DC)         BN2 bias, f32
    w3_ref  : (DC, Cout)      1x1 expand weight, BN3 scale folded in
    b3_ref  : (1, Cout)       BN3 bias, f32
    o_ref   : (H, W, Cout)    output image
    xpad_ref: (H+2, W+2, DC)  VMEM scratch: halo-padded stage-1 activation
    """
    cin = x_ref.shape[-1]
    cout = o_ref.shape[-1]
    mm_dtype = w1_ref.dtype          # matmul operand dtype (f32 or bf16)

    # Residual stays in f32; a cast copy feeds the MXU.
    x2d = x_ref[...].reshape(H * W, cin)

    # ---- stage 1: 1x1 reduce conv + BN + ReLU (BN scale pre-folded) ---------
    y1 = jnp.dot(x2d.astype(mm_dtype), w1_ref[...],
                 preferred_element_type=jnp.float32)
    y1 = jnp.maximum(y1 + b1_ref[...], 0.0)

    # ---- stage 2: grouped 3x3 conv + BN + ReLU ------------------------------
    # Halo padding lives only in VMEM: zero the scratch, write the interior.
    xpad_ref[...] = jnp.zeros_like(xpad_ref)
    xpad_ref[1:H + 1, 1:W + 1, :] = y1.reshape(H, W, DC).astype(xpad_ref.dtype)

    # 9 block-diagonal tap matmuls, each lane-dense over the full DC width.
    acc = jnp.zeros((H * W, DC), jnp.float32)
    for ky in range(3):
        for kx in range(3):
            xs = xpad_ref[ky:ky + H, kx:kx + W, :].reshape(H * W, DC)
            acc = acc + jnp.dot(xs, w2_ref[ky * 3 + kx],
                                preferred_element_type=jnp.float32)
    y2 = jnp.maximum(acc + b2_ref[...], 0.0)

    # ---- stage 3: 1x1 expand conv + BN + residual + ReLU (lane-dense store) -
    y3 = jnp.dot(y2.astype(mm_dtype), w3_ref[...],
                 preferred_element_type=jnp.float32)
    y3 = y3 + b3_ref[...] + x2d
    o_ref[...] = jnp.maximum(y3, 0.0).reshape(H, W, cout).astype(o_ref.dtype)


# ------------------------------ forward wrapper ------------------------------


def resnext_bottleneck_forward(x_nchw, params):
    """Forward pass; x in PyTorch NCHW layout, params from prepare_params()."""
    n, cin, h, w = x_nchw.shape
    dc = params["w1"].shape[1]
    cout = params["w3"].shape[1]
    if cin != cout:
        # TODO(synk): stride>1 / downsample projection path not implemented.
        raise NotImplementedError(
            "downsample=None path requires inplanes == planes * 4")

    x_nhwc = jnp.transpose(x_nchw, (0, 2, 3, 1)).astype(jnp.float32)

    kernel = functools.partial(_resnext_block_kernel, H=h, W=w, DC=dc)
    out_nhwc = pl.pallas_call(
        kernel,
        out_shape=jax.ShapeDtypeStruct((n, h, w, cout), jnp.float32),
        grid=(n,),
        in_specs=[
            pl.BlockSpec((None, h, w, cin), lambda b: (b, 0, 0, 0)),
            pl.BlockSpec((cin, dc), lambda b: (0, 0)),
            pl.BlockSpec((1, dc), lambda b: (0, 0)),
            pl.BlockSpec((9, dc, dc), lambda b: (0, 0, 0)),
            pl.BlockSpec((1, dc), lambda b: (0, 0)),
            pl.BlockSpec((dc, cout), lambda b: (0, 0)),
            pl.BlockSpec((1, cout), lambda b: (0, 0)),
        ],
        out_specs=pl.BlockSpec((None, h, w, cout), lambda b: (b, 0, 0, 0)),
        scratch_shapes=[pltpu.VMEM((h + 2, w + 2, dc), params["w1"].dtype)],
        compiler_params=pltpu.CompilerParams(
            dimension_semantics=("parallel",)),
    )(x_nhwc, params["w1"], params["b1"], params["w2"], params["b2"],
      params["w3"], params["b3"])

    return jnp.transpose(out_nhwc, (0, 3, 1, 2))


# ------------------------- trace-time weight folding -------------------------


def _fold_bn(gamma, beta, mean, var, eps=1e-5):
    scale = gamma / jnp.sqrt(var + eps)
    bias = beta - mean * scale
    return scale.astype(jnp.float32), bias.astype(jnp.float32)


def prepare_params(raw, *, cardinality, group_width,
                   matmul_dtype=jnp.float32, eps=1e-5):
    """Fold BN into weights, build block-diagonal 3x3 tap weights (static)."""
    C, D = cardinality, group_width
    DC = C * D
    cout = raw["w_expand_t"].shape[0]

    s1, b1 = _fold_bn(*raw["bn_reduce"], eps=eps)
    s2, b2 = _fold_bn(*raw["bn"], eps=eps)
    s3, b3 = _fold_bn(*raw["bn_expand"], eps=eps)

    # 1x1 convs -> matmul weights, BN scale folded per output channel.
    w1 = raw["w_reduce_t"][:, :, 0, 0].T * s1[None, :]          # (Cin, DC)
    w3 = raw["w_expand_t"][:, :, 0, 0].T * s3[None, :]          # (DC, Cout)

    # grouped 3x3 conv -> 9 block-diagonal (DC, DC) tap matrices.
    wc = raw["w_conv_t"].reshape(C, D, D, 3, 3)                  # (g,out,in,ky,kx)
    wt = jnp.transpose(wc, (3, 4, 0, 2, 1)).reshape(9, C, D, D)  # (tap,g,in,out)
    eye_c = jnp.eye(C, dtype=jnp.float32)
    w2 = wt[:, :, :, None, :] * eye_c[None, :, None, :, None]    # (9,C,D,C,D)
    w2 = w2.reshape(9, DC, DC) * s2[None, None, :]               # BN2 scale fold

    return {
        "w1": w1.astype(matmul_dtype), "b1": b1.reshape(1, DC),
        "w2": w2.astype(matmul_dtype), "b2": b2.reshape(1, DC),
        "w3": w3.astype(matmul_dtype), "b3": b3.reshape(1, cout),
    }


# ----------------------------- pure-JAX reference ----------------------------


def _reference_forward(x_nchw, raw, *, cardinality, eps=1e-5):
    def bn(x, p):
        gamma, beta, mean, var = p
        inv = gamma / jnp.sqrt(var + eps)
        return (x - mean[None, :, None, None]) * inv[None, :, None, None] \
            + beta[None, :, None, None]

    dn = ("NCHW", "OIHW", "NCHW")
    hi = lax.Precision.HIGHEST
    y = lax.conv_general_dilated(x_nchw, raw["w_reduce_t"], (1, 1), "VALID",
                                 dimension_numbers=dn, precision=hi)
    y = jax.nn.relu(bn(y, raw["bn_reduce"]))
    y = lax.conv_general_dilated(y, raw["w_conv_t"], (1, 1), ((1, 1), (1, 1)),
                                 dimension_numbers=dn,
                                 feature_group_count=cardinality, precision=hi)
    y = jax.nn.relu(bn(y, raw["bn"]))
    y = lax.conv_general_dilated(y, raw["w_expand_t"], (1, 1), "VALID",
                                 dimension_numbers=dn, precision=hi)
    y = bn(y, raw["bn_expand"])
    return jax.nn.relu(x_nchw + y)


# ----------------------------------- main ------------------------------------

if __name__ == "__main__":
    # ResNeXtBottleneck(inplanes=64, planes=16, cardinality=4, base_width=64)
    # -> D = 16, C = 4, D*C = 64, out = planes*4 = 64 (== inplanes, so the
    # downsample=None / stride=1 residual path is exercised).
    inplanes, planes, cardinality, base_width = 64, 16, 4, 64
    D = int(math.floor(planes * (base_width / 64.0)))
    C = cardinality
    DC = D * C
    Cout = planes * 4
    N, H, W = 2, 8, 8

    key = jax.random.PRNGKey(0)
    ks = jax.random.split(key, 8)

    # PyTorch-shaped weights (OIHW), deterministic He-style init.
    w_reduce_t = jax.random.normal(ks[0], (DC, inplanes, 1, 1), jnp.float32) / math.sqrt(inplanes)
    w_conv_t = jax.random.normal(ks[1], (DC, D, 3, 3), jnp.float32) / math.sqrt(D * 9)
    w_expand_t = jax.random.normal(ks[2], (Cout, DC, 1, 1), jnp.float32) / math.sqrt(DC)

    def make_bn(k, c):
        k1, k2, k3, k4 = jax.random.split(k, 4)
        gamma = 0.5 + jax.random.uniform(k1, (c,), jnp.float32)
        beta = 0.1 * jax.random.normal(k2, (c,), jnp.float32)
        mean = 0.1 * jax.random.normal(k3, (c,), jnp.float32)
        var = 0.5 + jax.random.uniform(k4, (c,), jnp.float32)
        return (gamma, beta, mean, var)

    raw = {
        "w_reduce_t": w_reduce_t,
        "w_conv_t": w_conv_t,
        "w_expand_t": w_expand_t,
        "bn_reduce": make_bn(ks[3], DC),
        "bn": make_bn(ks[4], DC),
        "bn_expand": make_bn(ks[5], Cout),
    }

    x = jax.random.normal(ks[6], (N, inplanes, H, W), jnp.float32)  # NCHW input
    ref = jax.block_until_ready(_reference_forward(x, raw, cardinality=C))

    # f32 matmul path: tight-tolerance correctness baseline.
    prm_f32 = prepare_params(raw, cardinality=C, group_width=D,
                             matmul_dtype=jnp.float32)
    out_f32 = jax.block_until_ready(resnext_bottleneck_forward(x, prm_f32))
    assert out_f32.shape == (N, Cout, H, W)
    err_f32 = float(jnp.max(jnp.abs(out_f32 - ref)))
    assert jnp.allclose(out_f32, ref, atol=1e-4, rtol=1e-4), err_f32

    # bf16 matmul-operand path (MXU-native on v5e/v6e/v7x), f32 accumulation
    # and f32 elementwise epilogue.
    prm_bf16 = prepare_params(raw, cardinality=C, group_width=D,
                              matmul_dtype=jnp.bfloat16)
    out_bf16 = jax.block_until_ready(resnext_bottleneck_forward(x, prm_bf16))
    err_bf16 = float(jnp.max(jnp.abs(out_bf16 - ref)))
    assert jnp.allclose(out_bf16, ref, atol=5e-2, rtol=5e-2), err_bf16

    print("KERNEL_OK")
</pallas_src>

<mosaic_0001>
module attributes {stable_mosaic.version = 11 : i64} {
  func.func @_resnext_block_kernel(%arg0: i32, %arg1: memref<1x8x8x64xf32, #tpu.memory_space<vmem>>, %arg2: memref<64x64xf32, #tpu.memory_space<vmem>>, %arg3: memref<1x64xf32, #tpu.memory_space<vmem>>, %arg4: memref<9x64x64xf32, #tpu.memory_space<vmem>>, %arg5: memref<1x64xf32, #tpu.memory_space<vmem>>, %arg6: memref<64x64xf32, #tpu.memory_space<vmem>>, %arg7: memref<1x64xf32, #tpu.memory_space<vmem>>, %arg8: memref<1x8x8x64xf32, #tpu.memory_space<vmem>>, %arg9: memref<10x10x64xf32, #tpu.memory_space<vmem>>) attributes {dimension_semantics = [#tpu.dimension_semantics<parallel>], iteration_bounds = array<i64: 2>, scalar_prefetch = 0 : i64, scratch_operands = 1 : i64, tpu.core_type = #tpu.core_type<tc>, window_params = [{transform_indices = @transform_0, window_bounds = array<i64: 1, 8, 8, 64>}, {pipeline_mode = #tpu.pipeline_mode<synchronous>, transform_indices = @transform_1, window_bounds = array<i64: 64, 64>}, {pipeline_mode = #tpu.pipeline_mode<synchronous>, transform_indices = @transform_2, window_bounds = array<i64: 1, 64>}, {pipeline_mode = #tpu.pipeline_mode<synchronous>, transform_indices = @transform_3, window_bounds = array<i64: 9, 64, 64>}, {pipeline_mode = #tpu.pipeline_mode<synchronous>, transform_indices = @transform_4, window_bounds = array<i64: 1, 64>}, {pipeline_mode = #tpu.pipeline_mode<synchronous>, transform_indices = @transform_5, window_bounds = array<i64: 64, 64>}, {pipeline_mode = #tpu.pipeline_mode<synchronous>, transform_indices = @transform_6, window_bounds = array<i64: 1, 64>}, {transform_indices = @transform_7, window_bounds = array<i64: 1, 8, 8, 64>}]} {
    %c0 = arith.constant 0 : index
    %c0_0 = arith.constant 0 : index
    %c0_1 = arith.constant 0 : index
    %c0_2 = arith.constant 0 : index
    %0 = vector.load %arg1[%c0, %c0_0, %c0_1, %c0_2] : memref<1x8x8x64xf32, #tpu.memory_space<vmem>>, vector<1x8x8x64xf32>
    %1 = vector.shape_cast %0 : vector<1x8x8x64xf32> to vector<8x8x64xf32>
    %2 = vector.shape_cast %1 : vector<8x8x64xf32> to vector<64x64xf32>
    %c0_3 = arith.constant 0 : index
    %c0_4 = arith.constant 0 : index
    %3 = vector.load %arg2[%c0_3, %c0_4] : memref<64x64xf32, #tpu.memory_space<vmem>>, vector<64x64xf32>
    %cst = arith.constant dense<0.000000e+00> : vector<64x64xf32>
    %4 = tpu.matmul %2, %3, %cst {dimension_numbers = #tpu.dot_dimension_numbers<[1], [0], [0], [1], [0, 0, 1, 1], [], []>} : vector<64x64xf32>, vector<64x64xf32>, vector<64x64xf32> -> vector<64x64xf32>
    %c0_5 = arith.constant 0 : index
    %c0_6 = arith.constant 0 : index
    %5 = vector.load %arg3[%c0_5, %c0_6] : memref<1x64xf32, #tpu.memory_space<vmem>>, vector<1x64xf32>
    %6 = vector.broadcast %5 : vector<1x64xf32> to vector<64x64xf32>
    %7 = arith.addf %4, %6 : vector<64x64xf32>
    %cst_7 = arith.constant 0.000000e+00 : f32
    %8 = vector.broadcast %cst_7 : f32 to vector<64x64xf32>
    %9 = arith.maximumf %7, %8 : vector<64x64xf32>
    %cst_8 = arith.constant 0.000000e+00 : f32
    %10 = vector.broadcast %cst_8 : f32 to vector<10x10x64xf32>
    %c0_9 = arith.constant 0 : index
    %c0_10 = arith.constant 0 : index
    %c0_11 = arith.constant 0 : index
    %11 = vector.load %arg9[%c0_9, %c0_10, %c0_11] : memref<10x10x64xf32, #tpu.memory_space<vmem>>, vector<10x10x64xf32>
    tpu.vector_store %arg9[%c0_9, %c0_10, %c0_11], %10 {strides = array<i32>} : memref<10x10x64xf32, #tpu.memory_space<vmem>>, vector<10x10x64xf32>,
    %12 = vector.shape_cast %9 : vector<64x64xf32> to vector<8x8x64xf32>
    %c1 = arith.constant 1 : index
    %c1_12 = arith.constant 1 : index
    %c0_13 = arith.constant 0 : index
    %13 = vector.load %arg9[%c1, %c1_12, %c0_13] : memref<10x10x64xf32, #tpu.memory_space<vmem>>, vector<8x8x64xf32>
    tpu.vector_store %arg9[%c1, %c1_12, %c0_13], %12 {strides = array<i32>} : memref<10x10x64xf32, #tpu.memory_space<vmem>>, vector<8x8x64xf32>,
    %cst_14 = arith.constant 0.000000e+00 : f32
    %14 = vector.broadcast %cst_14 : f32 to vector<64x64xf32>
    %c0_15 = arith.constant 0 : index
    %c0_16 = arith.constant 0 : index
    %c0_17 = arith.constant 0 : index
    %15 = vector.load %arg9[%c0_15, %c0_16, %c0_17] : memref<10x10x64xf32, #tpu.memory_space<vmem>>, vector<8x8x64xf32>
    %16 = vector.shape_cast %15 : vector<8x8x64xf32> to vector<64x64xf32>
    %c0_18 = arith.constant 0 : index
    %c0_19 = arith.constant 0 : index
    %c0_20 = arith.constant 0 : index
    %17 = vector.load %arg4[%c0_18, %c0_19, %c0_20] : memref<9x64x64xf32, #tpu.memory_space<vmem>>, vector<1x64x64xf32>
    %18 = vector.shape_cast %17 : vector<1x64x64xf32> to vector<64x64xf32>
    %cst_21 = arith.constant dense<0.000000e+00> : vector<64x64xf32>
    %19 = tpu.matmul %16, %18, %cst_21 {dimension_numbers = #tpu.dot_dimension_numbers<[1], [0], [0], [1], [0, 0, 1, 1], [], []>} : vector<64x64xf32>, vector<64x64xf32>, vector<64x64xf32> -> vector<64x64xf32>
    %20 = arith.addf %14, %19 : vector<64x64xf32>
    %c0_22 = arith.constant 0 : index
    %c1_23 = arith.constant 1 : index
    %c0_24 = arith.constant 0 : index
    %21 = vector.load %arg9[%c0_22, %c1_23, %c0_24] : memref<10x10x64xf32, #tpu.memory_space<vmem>>, vector<8x8x64xf32>
    %22 = vector.shape_cast %21 : vector<8x8x64xf32> to vector<64x64xf32>
    %c1_25 = arith.constant 1 : index
    %c0_26 = arith.constant 0 : index
    %c0_27 = arith.constant 0 : index
    %23 = vector.load %arg4[%c1_25, %c0_26, %c0_27] : memref<9x64x64xf32, #tpu.memory_space<vmem>>, vector<1x64x64xf32>
    %24 = vector.shape_cast %23 : vector<1x64x64xf32> to vector<64x64xf32>
    %cst_28 = arith.constant dense<0.000000e+00> : vector<64x64xf32>
    %25 = tpu.matmul %22, %24, %cst_28 {dimension_numbers = #tpu.dot_dimension_numbers<[1], [0], [0], [1], [0, 0, 1, 1], [], []>} : vector<64x64xf32>, vector<64x64xf32>, vector<64x64xf32> -> vector<64x64xf32>
    %26 = arith.addf %20, %25 : vector<64x64xf32>
    %c0_29 = arith.constant 0 : index
    %c2 = arith.constant 2 : index
    %c0_30 = arith.constant 0 : index
    %27 = vector.load %arg9[%c0_29, %c2, %c0_30] : memref<10x10x64xf32, #tpu.memory_space<vmem>>, vector<8x8x64xf32>
    %28 = vector.shape_cast %27 : vector<8x8x64xf32> to vector<64x64xf32>
    %c2_31 = arith.constant 2 : index
    %c0_32 = arith.constant 0 : index
    %c0_33 = arith.constant 0 : index
    %29 = vector.load %arg4[%c2_31, %c0_32, %c0_33] : memref<9x64x64xf32, #tpu.memory_space<vmem>>, vector<1x64x64xf32>
    %30 = vector.shape_cast %29 : vector<1x64x64xf32> to vector<64x64xf32>
    %cst_34 = arith.constant dense<0.000000e+00> : vector<64x64xf32>
    %31 = tpu.matmul %28, %30, %cst_34 {dimension_numbers = #tpu.dot_dimension_numbers<[1], [0], [0], [1], [0, 0, 1, 1], [], []>} : vector<64x64xf32>, vector<64x64xf32>, vector<64x64xf32> -> vector<64x64xf32>
    %32 = arith.addf %26, %31 : vector<64x64xf32>
    %c1_35 = arith.constant 1 : index
    %c0_36 = arith.constant 0 : index
    %c0_37 = arith.constant 0 : index
    %33 = vector.load %arg9[%c1_35, %c0_36, %c0_37] : memref<10x10x64xf32, #tpu.memory_space<vmem>>, vector<8x8x64xf32>
    %34 = vector.shape_cast %33 : vector<8x8x64xf32> to vector<64x64xf32>
    %c3 = arith.constant 3 : index
    %c0_38 = arith.constant 0 : index
    %c0_39 = arith.constant 0 : index
    %35 = vector.load %arg4[%c3, %c0_38, %c0_39] : memref<9x64x64xf32, #tpu.memory_space<vmem>>, vector<1x64x64xf32>
    %36 = vector.shape_cast %35 : vector<1x64x64xf32> to vector<64x64xf32>
    %cst_40 = arith.constant dense<0.000000e+00> : vector<64x64xf32>
    %37 = tpu.matmul %34, %36, %cst_40 {dimension_numbers = #tpu.dot_dimension_numbers<[1], [0], [0], [1], [0, 0, 1, 1], [], []>} : vector<64x64xf32>, vector<64x64xf32>, vector<64x64xf32> -> vector<64x64xf32>
    %38 = arith.addf %32, %37 : vector<64x64xf32>
    %c1_41 = arith.constant 1 : index
    %c1_42 = arith.constant 1 : index
    %c0_43 = arith.constant 0 : index
    %39 = vector.load %arg9[%c1_41, %c1_42, %c0_43] : memref<10x10x64xf32, #tpu.memory_space<vmem>>, vector<8x8x64xf32>
    %40 = vector.shape_cast %39 : vector<8x8x64xf32> to vector<64x64xf32>
    %c4 = arith.constant 4 : index
    %c0_44 = arith.constant 0 : index
    %c0_45 = arith.constant 0 : index
    %41 = vector.load %arg4[%c4, %c0_44, %c0_45] : memref<9x64x64xf32, #tpu.memory_space<vmem>>, vector<1x64x64xf32>
    %42 = vector.shape_cast %41 : vector<1x64x64xf32> to vector<64x64xf32>
    %cst_46 = arith.constant dense<0.000000e+00> : vector<64x64xf32>
    %43 = tpu.matmul %40, %42, %cst_46 {dimension_numbers = #tpu.dot_dimension_numbers<[1], [0], [0], [1], [0, 0, 1, 1], [], []>} : vector<64x64xf32>, vector<64x64xf32>, vector<64x64xf32> -> vector<64x64xf32>
    %44 = arith.addf %38, %43 : vector<64x64xf32>
    %c1_47 = arith.constant 1 : index
    %c2_48 = arith.constant 2 : index
    %c0_49 = arith.constant 0 : index
    %45 = vector.load %arg9[%c1_47, %c2_48, %c0_49] : memref<10x10x64xf32, #tpu.memory_space<vmem>>, vector<8x8x64xf32>
    %46 = vector.shape_cast %45 : vector<8x8x64xf32> to vector<64x64xf32>
    %c5 = arith.constant 5 : index
    %c0_50 = arith.constant 0 : index
    %c0_51 = arith.constant 0 : index
    %47 = vector.load %arg4[%c5, %c0_50, %c0_51] : memref<9x64x64xf32, #tpu.memory_space<vmem>>, vector<1x64x64xf32>
    %48 = vector.shape_cast %47 : vector<1x64x64xf32> to vector<64x64xf32>
    %cst_52 = arith.constant dense<0.000000e+00> : vector<64x64xf32>
    %49 = tpu.matmul %46, %48, %cst_52 {dimension_numbers = #tpu.dot_dimension_numbers<[1], [0], [0], [1], [0, 0, 1, 1], [], []>} : vector<64x64xf32>, vector<64x64xf32>, vector<64x64xf32> -> vector<64x64xf32>
    %50 = arith.addf %44, %49 : vector<64x64xf32>
    %c2_53 = arith.constant 2 : index
    %c0_54 = arith.constant 0 : index
    %c0_55 = arith.constant 0 : index
    %51 = vector.load %arg9[%c2_53, %c0_54, %c0_55] : memref<10x10x64xf32, #tpu.memory_space<vmem>>, vector<8x8x64xf32>
    %52 = vector.shape_cast %51 : vector<8x8x64xf32> to vector<64x64xf32>
    %c6 = arith.constant 6 : index
    %c0_56 = arith.constant 0 : index
    %c0_57 = arith.constant 0 : index
    %53 = vector.load %arg4[%c6, %c0_56, %c0_57] : memref<9x64x64xf32, #tpu.memory_space<vmem>>, vector<1x64x64xf32>
    %54 = vector.shape_cast %53 : vector<1x64x64xf32> to vector<64x64xf32>
    %cst_58 = arith.constant dense<0.000000e+00> : vector<64x64xf32>
    %55 = tpu.matmul %52, %54, %cst_58 {dimension_numbers = #tpu.dot_dimension_numbers<[1], [0], [0], [1], [0, 0, 1, 1], [], []>} : vector<64x64xf32>, vector<64x64xf32>, vector<64x64xf32> -> vector<64x64xf32>
    %56 = arith.addf %50, %55 : vector<64x64xf32>
    %c2_59 = arith.constant 2 : index
    %c1_60 = arith.constant 1 : index
    %c0_61 = arith.constant 0 : index
    %57 = vector.load %arg9[%c2_59, %c1_60, %c0_61] : memref<10x10x64xf32, #tpu.memory_space<vmem>>, vector<8x8x64xf32>
    %58 = vector.shape_cast %57 : vector<8x8x64xf32> to vector<64x64xf32>
    %c7 = arith.constant 7 : index
    %c0_62 = arith.constant 0 : index
    %c0_63 = arith.constant 0 : index
    %59 = vector.load %arg4[%c7, %c0_62, %c0_63] : memref<9x64x64xf32, #tpu.memory_space<vmem>>, vector<1x64x64xf32>
    %60 = vector.shape_cast %59 : vector<1x64x64xf32> to vector<64x64xf32>
    %cst_64 = arith.constant dense<0.000000e+00> : vector<64x64xf32>
    %61 = tpu.matmul %58, %60, %cst_64 {dimension_numbers = #tpu.dot_dimension_numbers<[1], [0], [0], [1], [0, 0, 1, 1], [], []>} : vector<64x64xf32>, vector<64x64xf32>, vector<64x64xf32> -> vector<64x64xf32>
    %62 = arith.addf %56, %61 : vector<64x64xf32>
    %c2_65 = arith.constant 2 : index
    %c2_66 = arith.constant 2 : index
    %c0_67 = arith.constant 0 : index
    %63 = vector.load %arg9[%c2_65, %c2_66, %c0_67] : memref<10x10x64xf32, #tpu.memory_space<vmem>>, vector<8x8x64xf32>
    %64 = vector.shape_cast %63 : vector<8x8x64xf32> to vector<64x64xf32>
    %c8 = arith.constant 8 : index
    %c0_68 = arith.constant 0 : index
    %c0_69 = arith.constant 0 : index
    %65 = vector.load %arg4[%c8, %c0_68, %c0_69] : memref<9x64x64xf32, #tpu.memory_space<vmem>>, vector<1x64x64xf32>
    %66 = vector.shape_cast %65 : vector<1x64x64xf32> to vector<64x64xf32>
    %cst_70 = arith.constant dense<0.000000e+00> : vector<64x64xf32>
    %67 = tpu.matmul %64, %66, %cst_70 {dimension_numbers = #tpu.dot_dimension_numbers<[1], [0], [0], [1], [0, 0, 1, 1], [], []>} : vector<64x64xf32>, vector<64x64xf32>, vector<64x64xf32> -> vector<64x64xf32>
    %68 = arith.addf %62, %67 : vector<64x64xf32>
    %c0_71 = arith.constant 0 : index
    %c0_72 = arith.constant 0 : index
    %69 = vector.load %arg5[%c0_71, %c0_72] : memref<1x64xf32, #tpu.memory_space<vmem>>, vector<1x64xf32>
    %70 = vector.broadcast %69 : vector<1x64xf32> to vector<64x64xf32>
    %71 = arith.addf %68, %70 : vector<64x64xf32>
    %cst_73 = arith.constant 0.000000e+00 : f32
    %72 = vector.broadcast %cst_73 : f32 to vector<64x64xf32>
    %73 = arith.maximumf %71, %72 : vector<64x64xf32>
    %c0_74 = arith.constant 0 : index
    %c0_75 = arith.constant 0 : index
    %74 = vector.load %arg6[%c0_74, %c0_75] : memref<64x64xf32, #tpu.memory_space<vmem>>, vector<64x64xf32>
    %cst_76 = arith.constant dense<0.000000e+00> : vector<64x64xf32>
    %75 = tpu.matmul %73, %74, %cst_76 {dimension_numbers = #tpu.dot_dimension_numbers<[1], [0], [0], [1], [0, 0, 1, 1], [], []>} : vector<64x64xf32>, vector<64x64xf32>, vector<64x64xf32> -> vector<64x64xf32>
    %c0_77 = arith.constant 0 : index
    %c0_78 = arith.constant 0 : index
    %76 = vector.load %arg7[%c0_77, %c0_78] : memref<1x64xf32, #tpu.memory_space<vmem>>, vector<1x64xf32>
    %77 = vector.broadcast %76 : vector<1x64xf32> to vector<64x64xf32>
    %78 = arith.addf %75, %77 : vector<64x64xf32>
    %79 = arith.addf %78, %2 : vector<64x64xf32>
    %cst_79 = arith.constant 0.000000e+00 : f32
    %80 = vector.broadcast %cst_79 : f32 to vector<64x64xf32>
    %81 = arith.maximumf %79, %80 : vector<64x64xf32>
    %82 = vector.shape_cast %81 : vector<64x64xf32> to vector<8x8x64xf32>
    %c0_80 = arith.constant 0 : index
    %c0_81 = arith.constant 0 : index
    %c0_82 = arith.constant 0 : index
    %c0_83 = arith.constant 0 : index
    %83 = vector.load %arg8[%c0_80, %c0_81, %c0_82, %c0_83] : memref<1x8x8x64xf32, #tpu.memory_space<vmem>>, vector<1x8x8x64xf32>
    %84 = vector.shape_cast %83 : vector<1x8x8x64xf32> to vector<8x8x64xf32>
    %85 = vector.shape_cast %82 : vector<8x8x64xf32> to vector<1x8x8x64xf32>
    tpu.vector_store %arg8[%c0_80, %c0_81, %c0_82, %c0_83], %85 {strides = array<i32>} : memref<1x8x8x64xf32, #tpu.memory_space<vmem>>, vector<1x8x8x64xf32>,
    return
  }
  func.func @transform_0(%arg0: i32) -> (i32, i32, i32, i32) {
    %c0_i32 = arith.constant 0 : i32
    %c0_i32_0 = arith.constant 0 : i32
    %c0_i32_1 = arith.constant 0 : i32
    %c0_i32_2 = arith.constant 0 : i32
    return %arg0, %c0_i32, %c0_i32_0, %c0_i32_1 : i32, i32, i32, i32
  }
  func.func @transform_1(%arg0: i32) -> (i32, i32) {
    %c0_i32 = arith.constant 0 : i32
    %c0_i32_0 = arith.constant 0 : i32
    %c0_i32_1 = arith.constant 0 : i32
    return %c0_i32, %c0_i32_0 : i32, i32
  }
  func.func @transform_2(%arg0: i32) -> (i32, i32) {
    %c0_i32 = arith.constant 0 : i32
    %c0_i32_0 = arith.constant 0 : i32
    %c0_i32_1 = arith.constant 0 : i32
    return %c0_i32, %c0_i32_0 : i32, i32
  }
  func.func @transform_3(%arg0: i32) -> (i32, i32, i32) {
    %c0_i32 = arith.constant 0 : i32
    %c0_i32_0 = arith.constant 0 : i32
    %c0_i32_1 = arith.constant 0 : i32
    %c0_i32_2 = arith.constant 0 : i32
    return %c0_i32, %c0_i32_0, %c0_i32_1 : i32, i32, i32
  }
  func.func @transform_4(%arg0: i32) -> (i32, i32) {
    %c0_i32 = arith.constant 0 : i32
    %c0_i32_0 = arith.constant 0 : i32
    %c0_i32_1 = arith.constant 0 : i32
    return %c0_i32, %c0_i32_0 : i32, i32
  }
  func.func @transform_5(%arg0: i32) -> (i32, i32) {
    %c0_i32 = arith.constant 0 : i32
    %c0_i32_0 = arith.constant 0 : i32
    %c0_i32_1 = arith.constant 0 : i32
    return %c0_i32, %c0_i32_0 : i32, i32
  }
  func.func @transform_6(%arg0: i32) -> (i32, i32) {
    %c0_i32 = arith.constant 0 : i32
    %c0_i32_0 = arith.constant 0 : i32
    %c0_i32_1 = arith.constant 0 : i32
    return %c0_i32, %c0_i32_0 : i32, i32
  }
  func.func @transform_7(%arg0: i32) -> (i32, i32, i32, i32) {
    %c0_i32 = arith.constant 0 : i32
    %c0_i32_0 = arith.constant 0 : i32
    %c0_i32_1 = arith.constant 0 : i32
    %c0_i32_2 = arith.constant 0 : i32
    return %arg0, %c0_i32, %c0_i32_0, %c0_i32_1 : i32, i32, i32, i32
  }
}

</mosaic_0001>

<bundles_post_ra>
// kernel: tpu_custom_call.1
= control target key start
LH: loop header
LB: loop body
LE: loop exit
PB: predicated region body
PF: predicated region fallthrough
CT: control target
= control target key end

     0   :  { %s2512_s0 = inlined_call_operand.hbm [shape: f32[2,8,8,64], index: 0, kind: input, shape index: {}]   ;;  %s2513_s1 = inlined_call_operand.hbm [shape: f32[64,64], index: 1, kind: input, shape index: {}]   ;;  %s2514_s2 = inlined_call_operand.vmem [shape: f32[1,64], index: 2, kind: input, shape index: {}]   ;;  %s2515_s3 = inlined_call_operand.hbm [shape: f32[9,64,64], index: 3, kind: input, shape index: {}]   ;;  %s2516_s4 = inlined_call_operand.vmem [shape: f32[1,64], index: 4, kind: input, shape index: {}]   ;;  %s2517_s5 = inlined_call_operand.hbm [shape: f32[64,64], index: 5, kind: input, shape index: {}]   ;;  %s2518_s6 = inlined_call_operand.vmem [shape: f32[1,64], index: 6, kind: input, shape index: {}]   ;;  %s2519_s7 = inlined_call_operand.hbm [shape: f32[2,8,8,64], index: 7, kind: output, shape index: {}]  }
   0x1   :  { %2522 = sst [smem:[#allocation16_spill]] %s2513_s1 }
   0x2   :  { %12 = vsyncpa [#allocation4], 0 }
   0x3   :  { %14 = vsyncpa [#allocation4 + $0x1], 0 }
   0x4   :  { %15 = vsyncpa [#allocation7], 0 }
   0x5   :  { %16 = vsyncpa [#allocation10], 0 }
   0x6   :  { %17 = vsyncpa [#allocation5], 0 }
   0x7   :  { %19 = vsyncpa [#allocation5 + $0x1], 0  ;;  %s1975_s24 = smov 0   ;;  %s1977_s25 = smov 0  }
   0x8   :  { %s1979_s26 = smov 0   ;;  %s1981_s27 = smov 0  }
   0x9 LB: > { %s1996_s28 = sadd.s32 4294967295, %s1925_s27   ;;  %s1506_s29 = sadd.s32 4294967294, %s1925_s27   ;;  %s1925_s27 = sphi %s1981_s27, %s2536_s27   ;;  %s1921_s26 = sphi %s1979_s26, %s2535_s26   ;;  %s1917_s25 = sphi %s1977_s25, %s2534_s25   ;;  %s1913_s24 = sphi %s1975_s24, %s2533_s24  }
   0xa   : > { %p45_p0 = scmp.ne.s32.totalorder %s1917_s25, %s1913_s24  ;;  %p46_p1 = scmp.eq.s32.totalorder %s1996_s28, 0 }
   0xb   : > { %p195_p2 = scmp.eq.s32.totalorder %s1996_s28, 1  ;;  %p201_p3 = scmp.eq.s32.totalorder %s1506_s29, 1 }
   0xc   : > { %p2005_p4 = por %p46_p1, %p45_p0  ;;  %p1507_p5 = scmp.ge.s32.totalorder %s1925_s27, 1 }
   0xd   : > { %p2010_p6 = por %p201_p3, %p45_p0  ;;  %p208_p7 = scmp.lt.s32.totalorder %s1925_s27, 3 }
   0xe   : > { %s2525_s1 = sld [smem:[#allocation16_spill]]  ;;  %s1927_s13 = smov [#allocation6]  }
   0xf   : > { %p2018_p8 = pnand %p1507_p5, %p208_p7  ;;  %s221_s14 = sshll.u32 %s1927_s13, 4  ;;  %s222_s14 = int_to_ptr.vmem [resolvable:$true] %s221_s14 }
  0x10   : > { %s236_s18 = sshll.u32 %s2515_s3, 4  ;;  %s2520_s19 = smov 128   ;;  %s237_s18 = int_to_ptr.hbm [resolvable:$true] %s236_s18 }
  0x11   : > { %p1656_p9 = pneg %p2018_p8  ;;  %s2521_s20 = smov 8  }
  0x12   : > { %s1930_s21 = smov [#allocation8]   ;;  %s253_s9 = sshll.u32 %s2517_s5, 4  ;;  %s254_s9 = int_to_ptr.hbm [resolvable:$true] %s253_s9 }
  0x13   : > { %p2026_p10 = pnand %p1656_p9, %p46_p1  ;;  %s238_s22 = sshll.u32 %s1930_s21, 4  ;;  %s239_s22 = int_to_ptr.vmem [resolvable:$true] %s238_s22 }
  0x14   : > { %s219_s11 = sshll.u32 %s2525_s1, 4  ;;  %s1931_s10 = smov [#allocation9]   ;;  %s220_s11 = int_to_ptr.hbm [resolvable:$true] %s219_s11 }
  0x15   : > { %1659 = dma.hbm_to_vmem [thread:$0]  (!%p2026_p10), %s220_s11, 1024, %s222_s14, [#allocation7], %s2520_s19, %s2520_s19, %s2521_s20  }
  0x16   : > { %1662 = dma.hbm_to_vmem [thread:$0]  (!%p2026_p10), %s237_s18, 9216, %s239_s22, [#allocation7], %s2520_s19, %s2520_s19, %s2521_s20  }
  0x17   : > { %s255_s11 = sshll.u32 %s1931_s10, 4  ;;  %s2048_s13 = sadd.s32 1, %s1925_s27   ;;  %s256_s11 = int_to_ptr.vmem [resolvable:$true] %s255_s11 }
  0x18   : > { %1665 = dma.hbm_to_vmem [thread:$0]  (!%p2026_p10), %s254_s9, 1024, %s256_s11, [#allocation10], %s2520_s19, %s2520_s19, %s2521_s20  }
  0x19   : > { %s29_s14 = ssub.s32 %s1925_s27, %s2048_s13  ;;  %s32_s16 = sadd.s32 1, %s1921_s26 }
  0x1a   : > { %p30_p12 = scmp.eq.s32.totalorder %s29_s14, 0  ;;  %p39_p13 = scmp.ne.s32.totalorder %s1921_s26, %s1917_s25 }
  0x1b   : > { %p40_p0 = scmp.eq.s32.totalorder %s1925_s27, 0  ;;  %p1677_p5 = scmp.lt.s32.totalorder %s1925_s27, 2 }
  0x1c   : > { %s2062_s17 = scalar_select %p30_p12, %s1921_s26, %s32_s16  }
  0x1d   : > { %p2066_p3 = por %p195_p2, %p39_p13  ;;  %s272_s21 = sand.u32 1, %s1921_s26  }
  0x1e   : > { %s1614_s15 = sshll.u32 %s1925_s27, 6  ;;  %p41_p7 = por %p40_p0, %p39_p13 }
  0x1f   : > { %s1512_s22 = sshll.u32 %s272_s21, 6  ;;  %s281_s9 = scalar_lea.hbm %s2512_s0, %s1614_s15 }
  0x20   : > { %s282_s10 = sshll.u32 %s281_s9, 4  ;;  %s276_s11 = scalar_lea.vmem [#allocation3], %s1512_s22  ;;  %s283_s10 = int_to_ptr.hbm [resolvable:$true] %s282_s10 }
  0x21   : > { %s284_s14 = sshll.u32 %s276_s11, 4  ;;  %p2076_p9 = pnand %p1677_p5, %p41_p7  ;;  %s285_s14 = int_to_ptr.vmem [resolvable:$true] %s284_s14 }
  0x22   : > { %s273_s19 = scalar_lea.sflag [#allocation4], %s272_s21  ;;  %s1821_s20 = sshra.s32 %s283_s10, 4  ;;  %s1822_s20 = int_to_ptr.hbm [resolvable:$true] %s1821_s20 }
  0x23   : > { %s1823_s1 = scalar_lea.hbm %s1822_s20, 64  ;;  %p1825_p10 = pneg %p2076_p9 }
  0x24   : > { %p1824_p2 = scmp.ne.s32.totalorder %s1822_s20, %s1823_s1  ;;  %s1828_s22 = scalar_lea.hbm %s2512_s0, 128 }
  0x25   : > { %p1829_p0 = scmp.lt.s32.totalorder %s1822_s20, %s2512_s0  ;;  %p1830_p5 = scmp.lt.s32.totalorder %s1828_s22, %s1823_s1 }
  0x26   : > { %p1826_p12 = pnand %p1825_p10, %p1824_p2 }
  0x27   : > { %p1831_p7 = por %p1830_p5, %p1829_p0 }
  0x28   : > { %p1827_p13 = pneg %p1826_p12 }
  0x2a   : > { %p1832_p11 = pnand %p1831_p7, %p1827_p13 }
  0x2c   : > { %1835 = shalt.err (!%p1832_p11)
}
  0x2d   : > { %s2530_s21 = smov 8   ;;  %s2531_s11 = smov 128  }
  0x2e   : > { %1669 = dma.hbm_to_vmem [thread:$0]  (!%p2076_p9), %s283_s10, 1024, %s285_s14, %s273_s19, %s2531_s11, %s2531_s11, %s2530_s21  }
  0x2f   : > { %296 = sbr.rel (%p2018_p8) target bundleno = 661 (0x295), region = 48  ;;  %s2096_s15 = sand.u32 (!%p2018_p8), 1, %s1917_s25  }
  0x30   : > { %s1516_s1 = sshll.u32 (!%p2018_p8), %s2096_s15, 6  ;;  %s299_s20 = scalar_lea.sflag (!%p2018_p8), [#allocation4], %s2096_s15 }
  0x31   : > { %s2102_s23 = scalar_lea.vmem (!%p2018_p8), [#allocation3], %s1516_s1 }
  0x34   : > { %1896 = dma.done.wait (%p2005_p4), %s299_s20, 1024  }
  0x35   : > { %1898 = vsyncadd (%p2005_p4), %s299_s20, 4294966272 }
  0x36   : > { %1900 = dma.done.wait (%p46_p1), [#allocation7], 10240  }
  0x37   : > { %1902 = vsyncadd (%p46_p1), [#allocation7], 4294957056 }
  0x38   : > { %1904 = dma.done.wait (%p46_p1), [#allocation10], 1024  }
  0x39   : > { %1906 = vsyncadd (%p46_p1), [#allocation10], 4294966272  ;;  %v364_v0 = vld [vmem:[#allocation6 + $0x38] sm:$0xff]  ;;  %v363_v1 = vld [vmem:[#allocation6 + $0x30] sm:$0xff]  ;;  %vm369_vm0 = vcmask 523264   ;;  %vm444_vm1 = vcmask 517120  }
  0x3a   : > { %402 = vmatpush.msra.mxu0 %v364_v0  ;;  %1616 = vmatpush.msra.mxu3 %v364_v0  ;;  %v362_v2 = vld [vmem:[#allocation6 + $0x28] sm:$0xff]  ;;  %v361_v3 = vld [vmem:[#allocation6 + $0x20] sm:$0xff]  ;;  %v360_v4 = vld [vmem:[#allocation6 + $0x18] sm:$0xff]  ;;  %v1932_v26 = vmov 0.0   ;;  %s2453_s22 = scalar_lea.vmem [#allocation11], %s1516_s1  ;;  %s1615_s29 = sshll.u32 %s1996_s28, 6 }
  0x3b   : > { %v359_v5 = vld [vmem:[#allocation6 + $0x10] sm:$0xff]  ;;  %v358_v6 = vld [vmem:[#allocation6 + $0x8] sm:$0xff]  ;;  %v357_v7 = vld [vmem:[#allocation6] sm:$0xff]  ;;  %446 = vst.msk [vmem:[#allocation2 + $0x10] sm:$0xff] %vm369_vm0, %v1932_v26  ;;  %s1400_s11 = scalar_lea.hbm %s2519_s7, %s1615_s29  ;;  %s1401_s1 = sshll.u32 %s2453_s22, 4  ;;  %s1402_s1 = int_to_ptr.vmem [resolvable:$true] %s1401_s1 }
  0x3c   : > { %403 = vmatpush.msra.mxu0 %v363_v1  ;;  %1617 = vmatpush.msra.mxu3 %v363_v1  ;;  %v349_v8 = vld [vmem:[%s2102_s23] sm:$0xff]  ;;  %v351_v9 = vld [vmem:[%s2102_s23 + $0x10] sm:$0xff]  ;;  %v350_v10 = vld [vmem:[%s2102_s23 + $0x8] sm:$0xff]  ;;  %447 = vst.msk [vmem:[#allocation2 + $0x18] sm:$0x3] %vm444_vm1, %v1932_v26  ;;  %s1403_s20 = sshll.u32 %s1400_s11, 4  ;;  %s1404_s20 = int_to_ptr.hbm [resolvable:$true] %s1403_s20 }
  0x3d   : > { %v352_v11 = vld [vmem:[%s2102_s23 + $0x18] sm:$0xff]  ;;  %v504_v14 = vld [vmem:[#allocation8 + $0x70] sm:$0xff]  ;;  %v503_v16 = vld [vmem:[#allocation8 + $0x68] sm:$0xff]  ;;  %443 = vst.msk [vmem:[#allocation2] sm:$0xff] %vm369_vm0, %v1932_v26  ;;  %s1389_s28 = scalar_lea.sflag [#allocation5], %s2096_s15  ;;  %s1865_s30 = sshra.s32 %s1404_s20, 4  ;;  %s1866_s30 = int_to_ptr.hbm [resolvable:$true] %s1865_s30 }
  0x3e   : > { %404 = vmatpush.msra.mxu0 %v362_v2  ;;  %1618 = vmatpush.msra.mxu3 %v362_v2  ;;  %v505_v12 = vld [vmem:[#allocation8 + $0x78] sm:$0xff]  ;;  %v651_v15 = vld [vmem:[#allocation8 + $0xb0] sm:$0xff]  ;;  %v650_v17 = vld [vmem:[#allocation8 + $0xa8] sm:$0xff]  ;;  %445 = vst.msk [vmem:[#allocation2 + $0x8] sm:$0x3] %vm444_vm1, %v1932_v26  ;;  %s1867_s12 = scalar_lea.hbm %s1866_s30, 64  ;;  %p1872_p11 = scmp.lt.s32.totalorder %s1866_s30, %s2519_s7 }
  0x3f   : > { %v652_v13 = vld [vmem:[#allocation8 + $0xb8] sm:$0xff]  ;;  %1624 = vmatpush.msra.mxu1 %v505_v12  ;;  %v502_v18 = vld [vmem:[#allocation8 + $0x60] sm:$0xff]  ;;  %v2127_v23 = vld [vmem:[%s2102_s23 + $0x28] sm:$0xff]  ;;  %448 = vst.msk [vmem:[#allocation2 + $0x20] sm:$0xff] %vm369_vm0, %v1932_v26  ;;  %p1868_p1 = scmp.ne.s32.totalorder %s1866_s30, %s1867_s12  ;;  %s1871_s14 = scalar_lea.hbm %s2519_s7, 128 }
  0x40   : > { %405 = vmatpush.msra.mxu0 %v361_v3  ;;  %1619 = vmatpush.msra.mxu3 %v361_v3  ;;  %v649_v19 = vld [vmem:[#allocation8 + $0xa0] sm:$0xff]  ;;  %v501_v21 = vld [vmem:[#allocation8 + $0x58] sm:$0xff]  ;;  %v2132_v24 = vld [vmem:[%s2102_s23 + $0x30] sm:$0xff]  ;;  %449 = vst.msk [vmem:[#allocation2 + $0x28] sm:$0x3] %vm444_vm1, %v1932_v26  ;;  %p1873_p9 = scmp.lt.s32.totalorder %s1871_s14, %s1867_s12 }
  0x41   : > { %1625 = vmatpush.msra.mxu1 %v504_v14  ;;  %v353_v20 = vld [vmem:[%s2102_s23 + $0x20] sm:$0xff]  ;;  %v648_v22 = vld [vmem:[#allocation8 + $0x98] sm:$0xff]  ;;  %v500_v27 = vld [vmem:[#allocation8 + $0x50] sm:$0xff]  ;;  %450 = vst.msk [vmem:[#allocation2 + $0x30] sm:$0xff] %vm369_vm0, %v1932_v26  ;;  %p1869_p4 = pnand %p1868_p1, %p2066_p3 }
  0x42   : > { %406 = vmatpush.msra.mxu0 %v360_v4  ;;  %1620 = vmatpush.msra.mxu3 %v360_v4  ;;  %v356_v25 = vld [vmem:[%s2102_s23 + $0x38] sm:$0xff]  ;;  %v647_v28 = vld [vmem:[#allocation8 + $0x90] sm:$0xff]  ;;  %v499_v29 = vld [vmem:[#allocation8 + $0x48] sm:$0xff]  ;;  %451 = vst.msk [vmem:[#allocation2 + $0x38] sm:$0x3] %vm444_vm1, %v1932_v26  ;;  %p1874_p2 = por %p1873_p9, %p1872_p11 }
  0x43   : > { %1626 = vmatpush.msra.mxu1 %v503_v16  ;;  %v646_v30 = vld [vmem:[#allocation8 + $0x88] sm:$0xff]  ;;  %v498_v31 = vld [vmem:[#allocation8 + $0x40] sm:$0xff]  ;;  %452 = vst.msk [vmem:[#allocation2 + $0x40] sm:$0xff] %vm369_vm0, %v1932_v26  ;;  %v488_v33 = vld [vmem:[#allocation8 + $0x38] sm:$0xff]  ;;  %p1870_p8 = pneg %p1869_p4 }
  0x44   : > { %407 = vmatpush.msra.mxu0 %v359_v5  ;;  %1621 = vmatpush.msra.mxu3 %v359_v5  ;;  %v645_v32 = vld [vmem:[#allocation8 + $0x80] sm:$0xff]  ;;  %453 = vst.msk [vmem:[#allocation2 + $0x48] sm:$0x3] %vm444_vm1, %v1932_v26  ;;  %v487_v36 = vld [vmem:[#allocation8 + $0x30] sm:$0xff]  ;;  %v486_v37 = vld [vmem:[#allocation8 + $0x28] sm:$0xff] }
  0x45   : > { %1627 = vmatpush.msra.mxu1 %v502_v18  ;;  %1632 = vmatpush.msra.mxu2 %v488_v33  ;;  %454 = vst.msk [vmem:[#allocation2 + $0x50] sm:$0xff] %vm369_vm0, %v1932_v26  ;;  %v489_v34 = vld [vmem:[#allocation2 + $0x1] sm:$0xff]  ;;  %v484_v39 = vld [vmem:[#allocation8 + $0x18] sm:$0xff]  ;;  %v483_v40 = vld [vmem:[#allocation8 + $0x10] sm:$0xff]  ;;  %p1875_p10 = pnand %p1874_p2, %p1870_p8 }
  0x46   : > { %408 = vmatpush.msra.mxu0 %v358_v6  ;;  %1622 = vmatpush.msra.mxu3 %v358_v6  ;;  %v636_v35 = vld [vmem:[#allocation2 + $0x2] sm:$0xff]  ;;  %455 = vst.msk [vmem:[#allocation2 + $0x58] sm:$0x3] %vm444_vm1, %v1932_v26  ;;  %v832_v43 = vld [vmem:[#allocation8 + $0x138] sm:$0xff]  ;;  %v741_v45 = vld [vmem:[#allocation8 + $0xf0] sm:$0xff] }
  0x47   : > { %1628 = vmatpush.msra.mxu1 %v501_v21  ;;  %456 = vst.msk [vmem:[#allocation2 + $0x60] sm:$0xff] %vm369_vm0, %v1932_v26  ;;  %1633 = vmatpush.msra.mxu2 %v487_v36  ;;  %v485_v38 = vld [vmem:[#allocation8 + $0x20] sm:$0xff]  ;;  %v482_v41 = vld [vmem:[#allocation8 + $0x8] sm:$0xff]  ;;  %v742_v44 = vld [vmem:[#allocation8 + $0xf8] sm:$0xff] }
  0x48   : > { %409 = vmatpush.msra.mxu0 %v357_v7  ;;  %1623 = vmatpush.msra.mxu3 %v357_v7  ;;  %457 = vst.msk [vmem:[#allocation2 + $0x68] sm:$0x3] %vm444_vm1, %v1932_v26  ;;  %v481_v42 = vld [vmem:[#allocation8] sm:$0xff]  ;;  %v831_v46 = vld [vmem:[#allocation8 + $0x130] sm:$0xff]  ;;  %v740_v47 = vld [vmem:[#allocation8 + $0xe8] sm:$0xff] }
  0x49   : > { %1521 = vmatmul.msk.f32.vlgmr.msra.gmra.mxu0 %vm369_vm0, %v349_v8  ;;  %1523 = vmatmul.msk.f32.vlgmr.msra.gmra.mxu3 %vm369_vm0, %v351_v9  ;;  %458 = vst.msk [vmem:[#allocation2 + $0x70] sm:$0xff] %vm369_vm0, %v1932_v26  ;;  %v739_v48 = vld [vmem:[#allocation8 + $0xe0] sm:$0xff]  ;;  %v738_v50 = vld [vmem:[#allocation8 + $0xd8] sm:$0xff]  ;;  %v737_v51 = vld [vmem:[#allocation8 + $0xd0] sm:$0xff] }
  0x4a   : > { %538 = vmatpush.msrb.mxu0 %v505_v12  ;;  %685 = vmatpush.msrb.mxu3 %v652_v13  ;;  %459 = vst.msk [vmem:[#allocation2 + $0x78] sm:$0x3] %vm444_vm1, %v1932_v26  ;;  %v2163_v49 = vld [vmem:[%s2514_s2] ss:$0 sm:$0xff]  ;;  %v830_v52 = vld [vmem:[#allocation8 + $0x128] sm:$0xff]  ;;  %v828_v4 = vld [vmem:[#allocation8 + $0x118] sm:$0xff] }
  0x4b   : > { %1629 = vmatpush.msra.mxu1 %v500_v27  ;;  %1634 = vmatpush.msra.mxu2 %v486_v37  ;;  %460 = vst.msk [vmem:[#allocation2 + $0x80] sm:$0xff] %vm369_vm0, %v1932_v26  ;;  %v736_v54 = vld [vmem:[#allocation8 + $0xc8] sm:$0xff]  ;;  %v735_v56 = vld [vmem:[#allocation8 + $0xc0] sm:$0xff]  ;;  %v827_v5 = vld [vmem:[#allocation8 + $0x110] sm:$0xff] }
  0x4c   : > { %539 = vmatpush.msrb.mxu0 %v504_v14  ;;  %686 = vmatpush.msrb.mxu3 %v651_v15  ;;  %461 = vst.msk [vmem:[#allocation2 + $0x88] sm:$0x3] %vm444_vm1, %v1932_v26  ;;  %v829_v59 = vld [vmem:[#allocation8 + $0x120] sm:$0xff]  ;;  %v922_v13 = vld [vmem:[#allocation8 + $0x178] sm:$0xff]  ;;  %v921_v15 = vld [vmem:[#allocation8 + $0x170] sm:$0xff] }
  0x4d   : > { %1630 = vmatpush.msra.mxu1 %v499_v29  ;;  %1635 = vmatpush.msra.mxu2 %v485_v38  ;;  %462 = vst.msk [vmem:[#allocation2 + $0x90] sm:$0xff] %vm369_vm0, %v1932_v26  ;;  %v473_v8 = vld [vmem:[#allocation2] sm:$0xff]  ;;  %v1013_v14 = vld [vmem:[#allocation8 + $0x1b8] sm:$0xff] }
  0x4e   : > { %540 = vmatpush.msrb.mxu0 %v503_v16  ;;  %687 = vmatpush.msrb.mxu3 %v650_v17  ;;  %463 = vst.msk [vmem:[#allocation2 + $0x98] sm:$0x3] %vm444_vm1, %v1932_v26  ;;  %v1012_v17 = vld [vmem:[#allocation8 + $0x1b0] sm:$0xff] }
  0x4f   : > { %1631 = vmatpush.msra.mxu1 %v498_v31  ;;  %1636 = vmatpush.msra.mxu2 %v484_v39 }
  0x50   : > { %541 = vmatpush.msrb.mxu0 %v502_v18  ;;  %688 = vmatpush.msrb.mxu3 %v649_v19  ;;  %v826_v18 = vld [vmem:[#allocation8 + $0x108] sm:$0xff] }
  0x51   : > { %1522 = vmatmul.msk.f32.gmra.mxu0 %vm369_vm0, %v350_v10  ;;  %1524 = vmatmul.msk.f32.gmra.mxu3 %vm369_vm0, %v352_v11  ;;  %v920_v19 = vld [vmem:[#allocation8 + $0x168] sm:$0xff] }
  0x52   : > { %542 = vmatpush.msrb.mxu0 %v501_v21  ;;  %689 = vmatpush.msrb.mxu3 %v648_v22 }
  0x53   : > { %1637 = vmatpush.msra.mxu2 %v483_v40  ;;  %865 = vmatpush.msrb.mxu1 %v832_v43  ;;  %v1007_v43 = vld [vmem:[#allocation8 + $0x188] sm:$0xff] }
  0x54   : > { %543 = vmatpush.msrb.mxu0 %v500_v27  ;;  %690 = vmatpush.msrb.mxu3 %v647_v28  ;;  %v919_v28 = vld [vmem:[#allocation8 + $0x160] sm:$0xff] }
  0x55   : > { %1638 = vmatpush.msra.mxu2 %v482_v41  ;;  %866 = vmatpush.msrb.mxu1 %v831_v46  ;;  %v1006_v46 = vld [vmem:[#allocation8 + $0x180] sm:$0xff] }
  0x56   : > { %544 = vmatpush.msrb.mxu0 %v499_v29  ;;  %691 = vmatpush.msrb.mxu3 %v646_v30  ;;  %v1010_v29 = vld [vmem:[#allocation8 + $0x1a0] sm:$0xff] }
  0x57   : > { %1639 = vmatpush.msra.mxu2 %v481_v42  ;;  %867 = vmatpush.msrb.mxu1 %v830_v52 }
  0x58   : > { %545 = vmatpush.msrb.mxu0 %v498_v31  ;;  %692 = vmatpush.msrb.mxu3 %v645_v32  ;;  %v918_v31 = vld [vmem:[#allocation8 + $0x158] sm:$0xff] }
  0x59   : > { %1525 = vmatmul.msk.f32.gmra.mxu3 %vm369_vm0, %v353_v20  ;;  %1529 = vmatmul.msk.f32.vlgmr.msrb.gmra.mxu0 %vm369_vm0, %v489_v34  ;;  %v1011_v20 = vld [vmem:[#allocation8 + $0x1a8] sm:$0xff]  ;;  %v1009_v32 = vld [vmem:[#allocation8 + $0x198] sm:$0xff] }
  0x5a   : > { %603 = vmatpush.msra.mxu0 %v488_v33  ;;  %868 = vmatpush.msrb.mxu1 %v829_v59  ;;  %v825_v33 = vld [vmem:[#allocation8 + $0x100] sm:$0xff] }
  0x5b   : > { %955 = vmatpush.msrb.mxu2 %v922_v13  ;;  %1046 = vmatpush.msra.mxu3 %v1013_v14  ;;  %v1189_v13 = vld [vmem:[#allocation8 + $0x218] sm:$0xff]  ;;  %v1186_v14 = vld [vmem:[#allocation8 + $0x200] sm:$0xff] }
  0x5c   : > { %604 = vmatpush.msra.mxu0 %v487_v36  ;;  %869 = vmatpush.msrb.mxu1 %v828_v4  ;;  %v1008_v36 = vld [vmem:[#allocation8 + $0x190] sm:$0xff] }
  0x5d   : > { %956 = vmatpush.msrb.mxu2 %v921_v15  ;;  %1047 = vmatpush.msra.mxu3 %v1012_v17 }
  0x5e   : > { %605 = vmatpush.msra.mxu0 %v486_v37  ;;  %870 = vmatpush.msrb.mxu1 %v827_v5  ;;  %v1103_v37 = vld [vmem:[#allocation8 + $0x1f8] sm:$0xff]  ;;  %v1190_v5 = vld [vmem:[#allocation8 + $0x220] sm:$0xff] }
  0x5f   : > { %957 = vmatpush.msrb.mxu2 %v920_v19  ;;  %1048 = vmatpush.msra.mxu3 %v1011_v20 }
  0x60   : > { %606 = vmatpush.msra.mxu0 %v485_v38  ;;  %871 = vmatpush.msrb.mxu1 %v826_v18 }
  0x61   : > { %1526 = vmatmul.msk.f32.gmra.mxu3 %vm369_vm0, %v2127_v23  ;;  %958 = vmatpush.msrb.mxu2 %v919_v28 }
  0x62   : > { %607 = vmatpush.msra.mxu0 %v484_v39  ;;  %1049 = vmatpush.msra.mxu3 %v1010_v29 }
  0x63   : > { %872 = vmatpush.msrb.mxu1 %v825_v33  ;;  %959 = vmatpush.msrb.mxu2 %v918_v31  ;;  %v1294_v33 = vld [vmem:[#allocation9 + $0x38] sm:$0xff] }
  0x64   : > { %608 = vmatpush.msra.mxu0 %v483_v40  ;;  %1050 = vmatpush.msra.mxu3 %v1009_v32 }
  0x66   : > { %609 = vmatpush.msra.mxu0 %v482_v41  ;;  %1051 = vmatpush.msra.mxu3 %v1008_v36 }
  0x68   : > { %610 = vmatpush.msra.mxu0 %v481_v42  ;;  %v916_v42 = vld [vmem:[#allocation8 + $0x148] sm:$0xff]  ;;  %1052 = vmatpush.msra.mxu3 %v1007_v43 }
  0x69   : > { %1527 = vmatmul.msk.f32.gmra.mxu3 %vm369_vm0, %v2132_v24 }
  0x6a   : > { %775 = vmatpush.msrb.mxu0 %v742_v44  ;;  %v915_v44 = vld [vmem:[#allocation8 + $0x140] sm:$0xff]  ;;  %1053 = vmatpush.msra.mxu3 %v1006_v46 }
  0x6c   : > { %776 = vmatpush.msrb.mxu0 %v741_v45 }
  0x6e   : > { %777 = vmatpush.msrb.mxu0 %v740_v47  ;;  %v1193_v47 = vld [vmem:[#allocation8 + $0x238] sm:$0xff] }
  0x70   : > { %778 = vmatpush.msrb.mxu0 %v739_v48  ;;  %v1102_v48 = vld [vmem:[#allocation8 + $0x1f0] sm:$0xff] }
  0x71   : > { %1528 = vmatmul.msk.f32.gmra.mxu3 %vm369_vm0, %v356_v25 }
  0x72   : > { %779 = vmatpush.msrb.mxu0 %v738_v50 }
  0x74   : > { %780 = vmatpush.msrb.mxu0 %v737_v51 }
  0x76   : > { %781 = vmatpush.msrb.mxu0 %v736_v54 }
  0x78   : > { %782 = vmatpush.msrb.mxu0 %v735_v56 }
  0x79   : > { %1545 = vmatmul.msk.f32.vlgmr.msrb.gmra.mxu3 %vm369_vm0, %v636_v35  ;;  %v917_v35 = vld [vmem:[#allocation8 + $0x150] sm:$0xff] }
  0x7a   : > { %960 = vmatpush.msrb.mxu2 %v917_v35 }
  0x7c   : > { %961 = vmatpush.msrb.mxu2 %v916_v42  ;;  %v1292_v42 = vld [vmem:[#allocation9 + $0x28] sm:$0xff] }
  0x7e   : > { %962 = vmatpush.msrb.mxu2 %v915_v44 }
  0xc6   : > { %v411_v53 = vpop.f32.mrf.mxu0 }
  0xc7   : > { %v412_v55 = vadd.f32 %v2163_v49, %v411_v53 }
  0xc9   : > { %v435_v57 = vmax.f32 %v412_v55, 0.0  ;;  %v1192_v55 = vld [vmem:[#allocation8 + $0x230] sm:$0xff] }
  0xcb   : > { %465 = vst.msk [vmem:[#allocation2 + $0x11] sm:$0xff] %vm369_vm0, %v435_v57  ;;  %v1101_v57 = vld [vmem:[#allocation8 + $0x1e8] sm:$0xff] }
  0xcc   : > { %v417_v58 = vpop.f32.mrf.mxu3 }
  0xcd   : > { %v418_v60 = vadd.f32 %v2163_v49, %v417_v58 }
  0xce   : > { %v414_v61 = vpop.f32.mrf.mxu0 }
  0xcf   : > { %v415_v62 = vadd.f32 %v2163_v49, %v414_v61  ;;  %v437_v63 = vmax.f32 %v418_v60, 0.0 }
  0xd1   : > { %v436_v0 = vmax.f32 %v415_v62, 0.0  ;;  %467 = vst.msk [vmem:[#allocation2 + $0x31] sm:$0xff] %vm369_vm0, %v437_v63  ;;  %v1100_v63 = vld [vmem:[#allocation8 + $0x1e0] sm:$0xff] }
  0xd2   : > { %v2170_v1 = vld [vmem:[#allocation2 + $0x11] sm:$0xff] }
  0xd3   : > { %v2172_v2 = vld [vmem:[#allocation2 + $0x12] sm:$0xff]  ;;  %466 = vst.msk [vmem:[#allocation2 + $0x21] sm:$0xff] %vm369_vm0, %v436_v0  ;;  %1530 = vmatmul.msk.f32.gmra.mxu0 %vm369_vm0, %v2170_v1 }
  0xd4   : > { %1546 = vmatmul.msk.f32.gmra.mxu3 %vm369_vm0, %v2172_v2  ;;  %v420_v3 = vpop.f32.mrf.mxu3  ;;  %v474_v27 = vld [vmem:[#allocation2 + $0x10] sm:$0xff] }
  0xd5   : > { %v421_v6 = vadd.f32 %v2163_v49, %v420_v3 }
  0xd6   : > { %v547_v17 = vpop.f32.mrf.mxu0 }
  0xd7   : > { %v438_v7 = vmax.f32 %v421_v6, 0.0  ;;  %v1099_v6 = vld [vmem:[#allocation8 + $0x1d8] sm:$0xff] }
  0xd8   : > { %v2195_v22 = vld [vmem:[#allocation2 + $0x31] sm:$0xff] }
  0xd9   : > { %468 = vst.msk [vmem:[#allocation2 + $0x41] sm:$0xff] %vm369_vm0, %v438_v7  ;;  %v2197_v25 = vld [vmem:[#allocation2 + $0x30] sm:$0xff] }
  0xda   : > { %v2181_v9 = vld [vmem:[#allocation2 + $0x21] sm:$0xff]  ;;  %v2199_v26 = vld [vmem:[#allocation2 + $0x32] sm:$0xff] }
  0xdb   : > { %v2183_v10 = vld [vmem:[#allocation2 + $0x20] sm:$0xff]  ;;  %1531 = vmatmul.msk.f32.vlgmr.msra.gmra.mxu1 %vm369_vm0, %v2181_v9  ;;  %1537 = vmatmul.msk.f32.vlgmr.msra.gmra.mxu0 %vm369_vm0, %v473_v8  ;;  %v1098_v7 = vld [vmem:[#allocation8 + $0x1d0] sm:$0xff]  ;;  %v1097_v8 = vld [vmem:[#allocation8 + $0x1c8] sm:$0xff] }
  0xdc   : > { %v2185_v11 = vld [vmem:[#allocation2 + $0x22] sm:$0xff]  ;;  %1539 = vmatmul.msk.f32.vlgmr.msra.gmra.mxu2 %vm369_vm0, %v2183_v10  ;;  %v423_v12 = vpop.f32.mrf.mxu3  ;;  %1136 = vmatpush.msra.mxu0 %v1103_v37 }
  0xdd   : > { %1547 = vmatmul.msk.f32.gmra.mxu3 %vm369_vm0, %v2185_v11  ;;  %v424_v16 = vadd.f32 %v2163_v49, %v423_v12  ;;  %1226 = vmatpush.msra.mxu1 %v1193_v47  ;;  %v1096_v12 = vld [vmem:[#allocation8 + $0x1c0] sm:$0xff] }
  0xde   : > { %1137 = vmatpush.msra.mxu0 %v1102_v48  ;;  %1331 = vmatpush.msra.mxu2 %v1294_v33  ;;  %v1291_v47 = vld [vmem:[#allocation9 + $0x20] sm:$0xff] }
  0xdf   : > { %v439_v21 = vmax.f32 %v424_v16, 0.0  ;;  %1227 = vmatpush.msra.mxu1 %v1192_v55 }
  0xe0   : > { %v2210_v39 = vld [vmem:[#allocation2 + $0x41] sm:$0xff]  ;;  %1138 = vmatpush.msra.mxu0 %v1101_v57  ;;  %v1289_v57 = vld [vmem:[#allocation9 + $0x10] sm:$0xff] }
  0xe1   : > { %469 = vst.msk [vmem:[#allocation2 + $0x51] sm:$0xff] %vm369_vm0, %v439_v21  ;;  %v2212_v40 = vld [vmem:[#allocation2 + $0x40] sm:$0xff] }
  0xe2   : > { %v2214_v41 = vld [vmem:[#allocation2 + $0x42] sm:$0xff]  ;;  %1139 = vmatpush.msra.mxu0 %v1100_v63 }
  0xe3   : > { %1532 = vmatmul.msk.f32.gmra.mxu1 %vm369_vm0, %v2195_v22  ;;  %1538 = vmatmul.msk.f32.gmra.mxu0 %vm369_vm0, %v474_v27 }
  0xe4   : > { %1540 = vmatmul.msk.f32.gmra.mxu2 %vm369_vm0, %v2197_v25  ;;  %v426_v30 = vpop.f32.mrf.mxu3  ;;  %1140 = vmatpush.msra.mxu0 %v1099_v6 }
  0xe5   : > { %1548 = vmatmul.msk.f32.gmra.mxu3 %vm369_vm0, %v2199_v26  ;;  %v427_v34 = vadd.f32 %v2163_v49, %v426_v30 }
  0xe6   : > { %1141 = vmatpush.msra.mxu0 %v1098_v7 }
  0xe7   : > { %v440_v38 = vmax.f32 %v427_v34, 0.0 }
  0xe8   : > { %v2225_v52 = vld [vmem:[#allocation2 + $0x51] sm:$0xff]  ;;  %1142 = vmatpush.msra.mxu0 %v1097_v8 }
  0xe9   : > { %470 = vst.msk [vmem:[#allocation2 + $0x61] sm:$0xff] %vm369_vm0, %v440_v38  ;;  %v2227_v53 = vld [vmem:[#allocation2 + $0x50] sm:$0xff] }
  0xea   : > { %v2229_v54 = vld [vmem:[#allocation2 + $0x52] sm:$0xff]  ;;  %1143 = vmatpush.msra.mxu0 %v1096_v12 }
  0xeb   : > { %1533 = vmatmul.msk.f32.gmra.mxu1 %vm369_vm0, %v2210_v39  ;;  %1553 = vmatmul.msk.f32.vlgmr.msrb.gmra.mxu0 %vm369_vm0, %v474_v27  ;;  %v1293_v38 = vld [vmem:[#allocation9 + $0x30] sm:$0xff] }
  0xec   : > { %1541 = vmatmul.msk.f32.gmra.mxu2 %vm369_vm0, %v2212_v40  ;;  %v429_v45 = vpop.f32.mrf.mxu3 }
  0xed   : > { %1549 = vmatmul.msk.f32.gmra.mxu3 %vm369_vm0, %v2214_v41  ;;  %v430_v50 = vadd.f32 %v2163_v49, %v429_v45  ;;  %1332 = vmatpush.msra.mxu2 %v1293_v38 }
  0xef   : > { %v441_v51 = vmax.f32 %v430_v50, 0.0  ;;  %1333 = vmatpush.msra.mxu2 %v1292_v42 }
  0xf0   : > { %v2241_v60 = vld [vmem:[#allocation2 + $0x61] sm:$0xff] }
  0xf1   : > { %471 = vst.msk [vmem:[#allocation2 + $0x71] sm:$0xff] %vm369_vm0, %v441_v51  ;;  %v479_v61 = vld [vmem:[#allocation2 + $0x60] sm:$0xff]  ;;  %1334 = vmatpush.msra.mxu2 %v1291_v47 }
  0xf2   : > { %v2243_v62 = vld [vmem:[#allocation2 + $0x62] sm:$0xff] }
  0xf3   : > { %1534 = vmatmul.msk.f32.gmra.mxu1 %vm369_vm0, %v2225_v52  ;;  %1554 = vmatmul.msk.f32.gmra.mxu0 %vm369_vm0, %v2183_v10 }
  0xf4   : > { %1542 = vmatmul.msk.f32.gmra.mxu2 %vm369_vm0, %v2227_v53  ;;  %v432_v56 = vpop.f32.mrf.mxu3 }
  0xf5   : > { %1550 = vmatmul.msk.f32.gmra.mxu3 %vm369_vm0, %v2229_v54  ;;  %v433_v58 = vadd.f32 %v2163_v49, %v432_v56  ;;  %v1191_v49 = vld [vmem:[#allocation8 + $0x228] sm:$0xff] }
  0xf6   : > { %1228 = vmatpush.msra.mxu1 %v1191_v49 }
  0xf7   : > { %v442_v59 = vmax.f32 %v433_v58, 0.0 }
  0xf8   : > { %v2253_v0 = vld [vmem:[#allocation2 + $0x71] sm:$0xff]  ;;  %1229 = vmatpush.msra.mxu1 %v1190_v5 }
  0xf9   : > { %472 = vst.msk [vmem:[#allocation2 + $0x81] sm:$0xff] %vm369_vm0, %v442_v59  ;;  %v480_v3 = vld [vmem:[#allocation2 + $0x70] sm:$0xff] }
  0xfa   : > { %v2255_v4 = vld [vmem:[#allocation2 + $0x72] sm:$0xff]  ;;  %1230 = vmatpush.msra.mxu1 %v1189_v13 }
  0xfb   : > { %1535 = vmatmul.msk.f32.gmra.mxu1 %vm369_vm0, %v2241_v60  ;;  %1555 = vmatmul.msk.f32.gmra.mxu0 %vm369_vm0, %v2197_v25 }
  0xfc   : > { %1543 = vmatmul.msk.f32.gmra.mxu2 %vm369_vm0, %v479_v61 }
  0xfd   : > { %1551 = vmatmul.msk.f32.gmra.mxu3 %vm369_vm0, %v2243_v62 }
 0x100   : > { %v823_v15 = vld [vmem:[#allocation2 + $0x81] sm:$0xff] }
 0x101   : > { %v913_v16 = vld [vmem:[#allocation2 + $0x82] sm:$0xff] }
 0x103   : > { %1536 = vmatmul.msk.f32.gmra.mxu1 %vm369_vm0, %v2253_v0  ;;  %1556 = vmatmul.msk.f32.gmra.mxu0 %vm369_vm0, %v2212_v40 }
 0x104   : > { %1544 = vmatmul.msk.f32.gmra.mxu2 %vm369_vm0, %v480_v3 }
 0x105   : > { %1552 = vmatmul.msk.f32.gmra.mxu3 %vm369_vm0, %v2255_v4 }
 0x10b   : > { %1557 = vmatmul.msk.f32.gmra.mxu0 %vm369_vm0, %v2227_v53  ;;  %1561 = vmatmul.msk.f32.vlgmr.msrb.gmra.mxu1 %vm369_vm0, %v2170_v1  ;;  %v1188_v1 = vld [vmem:[#allocation8 + $0x210] sm:$0xff] }
 0x10c   : > { %1569 = vmatmul.msk.f32.vlgmr.msrb.gmra.mxu2 %vm369_vm0, %v2172_v2  ;;  %1231 = vmatpush.msra.mxu1 %v1188_v1  ;;  %v1187_v2 = vld [vmem:[#allocation8 + $0x208] sm:$0xff] }
 0x10d   : > { %1577 = vmatmul.msk.f32.vlgmr.msra.gmra.mxu3 %vm369_vm0, %v2183_v10  ;;  %v733_v10 = vld [vmem:[#allocation2 + $0x80] sm:$0xff] }
 0x10e   : > { %1232 = vmatpush.msra.mxu1 %v1187_v2 }
 0x110   : > { %1233 = vmatpush.msra.mxu1 %v1186_v14 }
 0x113   : > { %1558 = vmatmul.msk.f32.gmra.mxu0 %vm369_vm0, %v479_v61  ;;  %1562 = vmatmul.msk.f32.gmra.mxu1 %vm369_vm0, %v2181_v9 }
 0x114   : > { %1570 = vmatmul.msk.f32.gmra.mxu2 %vm369_vm0, %v2185_v11 }
 0x115   : > { %1578 = vmatmul.msk.f32.gmra.mxu3 %vm369_vm0, %v2197_v25  ;;  %v1094_v25 = vld [vmem:[#allocation2 + $0x91] sm:$0xff] }
 0x11b   : > { %1559 = vmatmul.msk.f32.gmra.mxu0 %vm369_vm0, %v480_v3  ;;  %1563 = vmatmul.msk.f32.gmra.mxu1 %vm369_vm0, %v2195_v22 }
 0x11c   : > { %1571 = vmatmul.msk.f32.gmra.mxu2 %vm369_vm0, %v2199_v26 }
 0x11d   : > { %1579 = vmatmul.msk.f32.gmra.mxu3 %vm369_vm0, %v2212_v40 }
 0x123   : > { %1560 = vmatmul.msk.f32.gmra.mxu0 %vm369_vm0, %v733_v10  ;;  %1564 = vmatmul.msk.f32.gmra.mxu1 %vm369_vm0, %v2210_v39 }
 0x124   : > { %1572 = vmatmul.msk.f32.gmra.mxu2 %vm369_vm0, %v2214_v41 }
 0x125   : > { %1580 = vmatmul.msk.f32.gmra.mxu3 %vm369_vm0, %v2227_v53  ;;  %v1290_v53 = vld [vmem:[#allocation9 + $0x18] sm:$0xff] }
 0x126   : > { %1335 = vmatpush.msra.mxu2 %v1290_v53 }
 0x128   : > { %1336 = vmatpush.msra.mxu2 %v1289_v57 }
 0x12b   : > { %1565 = vmatmul.msk.f32.gmra.mxu1 %vm369_vm0, %v2225_v52  ;;  %1585 = vmatmul.msk.f32.vlgmr.msra.gmra.mxu0 %vm369_vm0, %v2181_v9  ;;  %v1004_v9 = vld [vmem:[#allocation2 + $0x90] sm:$0xff] }
 0x12c   : > { %1573 = vmatmul.msk.f32.gmra.mxu2 %vm369_vm0, %v2229_v54 }
 0x12d   : > { %1581 = vmatmul.msk.f32.gmra.mxu3 %vm369_vm0, %v479_v61 }
 0x133   : > { %1566 = vmatmul.msk.f32.gmra.mxu1 %vm369_vm0, %v2241_v60  ;;  %1586 = vmatmul.msk.f32.gmra.mxu0 %vm369_vm0, %v2195_v22 }
 0x134   : > { %1574 = vmatmul.msk.f32.gmra.mxu2 %vm369_vm0, %v2243_v62 }
 0x135   : > { %1582 = vmatmul.msk.f32.gmra.mxu3 %vm369_vm0, %v480_v3 }
 0x13b   : > { %1567 = vmatmul.msk.f32.gmra.mxu1 %vm369_vm0, %v2253_v0  ;;  %1587 = vmatmul.msk.f32.gmra.mxu0 %vm369_vm0, %v2210_v39 }
 0x13c   : > { %1575 = vmatmul.msk.f32.gmra.mxu2 %vm369_vm0, %v2255_v4 }
 0x13d   : > { %1583 = vmatmul.msk.f32.gmra.mxu3 %vm369_vm0, %v733_v10 }
 0x143   : > { %1568 = vmatmul.msk.f32.gmra.mxu1 %vm369_vm0, %v823_v15  ;;  %1588 = vmatmul.msk.f32.gmra.mxu0 %vm369_vm0, %v2225_v52 }
 0x144   : > { %1576 = vmatmul.msk.f32.gmra.mxu2 %vm369_vm0, %v913_v16 }
 0x145   : > { %1584 = vmatmul.msk.f32.gmra.mxu3 %vm369_vm0, %v1004_v9 }
 0x14b   : > { %1589 = vmatmul.msk.f32.gmra.mxu0 %vm369_vm0, %v2241_v60  ;;  %1593 = vmatmul.msk.f32.vlgmr.msra.gmra.mxu1 %vm369_vm0, %v2185_v11  ;;  %v1288_v60 = vld [vmem:[#allocation9 + $0x8] sm:$0xff] }
 0x14c   : > { %1337 = vmatpush.msra.mxu2 %v1288_v60 }
 0x150   : > { %v550_v18 = vpop.f32.mrf.mxu0 }
 0x153   : > { %1590 = vmatmul.msk.f32.gmra.mxu0 %vm369_vm0, %v2253_v0  ;;  %1594 = vmatmul.msk.f32.gmra.mxu1 %vm369_vm0, %v2199_v26  ;;  %v694_v26 = vpop.f32.mrf.mxu3  ;;  %v1287_v0 = vld [vmem:[#allocation9] sm:$0xff] }
 0x154   : > { %1338 = vmatpush.msra.mxu2 %v1287_v0 }
 0x158   : > { %v2327_v19 = vpop.f32.mrf.mxu1  ;;  %v612_v20 = vpop.f32.mrf.mxu0 }
 0x159   : > { %v2329_v21 = vadd.f32 %v612_v20, %v547_v17 }
 0x15b   : > { %1591 = vmatmul.msk.f32.gmra.mxu0 %vm369_vm0, %v823_v15  ;;  %1595 = vmatmul.msk.f32.gmra.mxu1 %vm369_vm0, %v2214_v41  ;;  %v697_v30 = vpop.f32.mrf.mxu3  ;;  %v1184_v41 = vld [vmem:[#allocation2 + $0x92] sm:$0xff]  ;;  %v718_v13 = vadd.f32 %v694_v26, %v2329_v21  ;;  %v2403_v21 = vld [vmem:[%s2516_s4] ss:$0 sm:$0xff] }
 0x15f   : > { %v618_v34 = vpop.f32.mrf.mxu2 }
 0x160   : > { %v2334_v22 = vpop.f32.mrf.mxu1  ;;  %v615_v11 = vpop.f32.mrf.mxu0 }
 0x161   : > { %v2336_v27 = vadd.f32 %v615_v11, %v550_v18 }
 0x163   : > { %1592 = vmatmul.msk.f32.gmra.mxu0 %vm369_vm0, %v1094_v25  ;;  %1596 = vmatmul.msk.f32.gmra.mxu1 %vm369_vm0, %v2229_v54  ;;  %v2351_v36 = vpop.f32.mrf.mxu3  ;;  %v719_v17 = vadd.f32 %v697_v30, %v2336_v27  ;;  %v619_v25 = vadd.f32 %v618_v34, %v2327_v19 }
 0x165   : > { %v720_v47 = vadd.f32 %v2351_v36, %v619_v25 }
 0x167   : > { %v2356_v39 = vpop.f32.mrf.mxu2 }
 0x168   : > { %v2341_v28 = vpop.f32.mrf.mxu1  ;;  %v784_v29 = vpop.f32.mrf.mxu0 }
 0x169   : > { %v808_v2 = vadd.f32 %v784_v29, %v718_v13 }
 0x16b   : > { %1597 = vmatmul.msk.f32.gmra.mxu1 %vm369_vm0, %v2243_v62  ;;  %v2360_v43 = vpop.f32.mrf.mxu3 }
 0x16f   : > { %v2365_v45 = vpop.f32.mrf.mxu2 }
 0x170   : > { %v2345_v31 = vpop.f32.mrf.mxu1  ;;  %v787_v32 = vpop.f32.mrf.mxu0 }
 0x171   : > { %v809_v20 = vadd.f32 %v787_v32, %v719_v17 }
 0x173   : > { %1598 = vmatmul.msk.f32.gmra.mxu1 %vm369_vm0, %v2255_v4  ;;  %v2367_v48 = vpop.f32.mrf.mxu3 }
 0x177   : > { %v2371_v52 = vpop.f32.mrf.mxu2 }
 0x178   : > { %v2349_v35 = vpop.f32.mrf.mxu1  ;;  %v2353_v37 = vpop.f32.mrf.mxu0 }
 0x179   : > { %v810_v30 = vadd.f32 %v2353_v37, %v720_v47 }
 0x17b   : > { %1599 = vmatmul.msk.f32.gmra.mxu1 %vm369_vm0, %v913_v16  ;;  %v2373_v54 = vpop.f32.mrf.mxu3 }
 0x17f   : > { %v2377_v58 = vpop.f32.mrf.mxu2 }
 0x180   : > { %v2358_v40 = vpop.f32.mrf.mxu1  ;;  %v2363_v44 = vpop.f32.mrf.mxu0 }
 0x183   : > { %1600 = vmatmul.msk.f32.gmra.mxu1 %vm369_vm0, %v1184_v41  ;;  %v2379_v61 = vpop.f32.mrf.mxu3 }
 0x187   : > { %v2383_v49 = vpop.f32.mrf.mxu2 }
 0x188   : > { %v874_v46 = vpop.f32.mrf.mxu1  ;;  %v2369_v50 = vpop.f32.mrf.mxu0 }
 0x189   : > { %v898_v10 = vadd.f32 %v874_v46, %v808_v2 }
 0x18b   : > { %v2387_v3 = vpop.f32.mrf.mxu3 }
 0x18f   : > { %v964_v5 = vpop.f32.mrf.mxu2 }
 0x190   : > { %v877_v51 = vpop.f32.mrf.mxu1  ;;  %v2375_v55 = vpop.f32.mrf.mxu0  ;;  %v988_v16 = vadd.f32 %v964_v5, %v898_v10 }
 0x191   : > { %v899_v33 = vadd.f32 %v877_v51, %v809_v20  ;;  %v622_v51 = vadd.f32 %v2356_v39, %v2334_v22  ;;  %v625_v22 = vadd.f32 %v2365_v45, %v2341_v28  ;;  %v628_v28 = vadd.f32 %v2371_v52, %v2345_v31 }
 0x192   : > { %v631_v31 = vadd.f32 %v2377_v58, %v2349_v35  ;;  %v634_v35 = vadd.f32 %v2383_v49, %v2358_v40 }
 0x193   : > { %v1055_v7 = vpop.f32.mrf.mxu3 }
 0x194   : > { %v1079_v11 = vadd.f32 %v1055_v7, %v988_v16  ;;  %v721_v7 = vadd.f32 %v2360_v43, %v622_v51  ;;  %v722_v43 = vadd.f32 %v2367_v48, %v625_v22 }
 0x196   : > { %v811_v37 = vadd.f32 %v2363_v44, %v721_v7 }
 0x197   : > { %v967_v1 = vpop.f32.mrf.mxu2 }
 0x198   : > { %v880_v56 = vpop.f32.mrf.mxu1  ;;  %v2381_v62 = vpop.f32.mrf.mxu0  ;;  %v989_v29 = vadd.f32 %v967_v1, %v899_v33 }
 0x199   : > { %v900_v53 = vadd.f32 %v880_v56, %v810_v30 }
 0x19b   : > { %v1058_v14 = vpop.f32.mrf.mxu3 }
 0x19c   : > { %v1080_v32 = vadd.f32 %v1058_v14, %v989_v29  ;;  %v723_v29 = vadd.f32 %v2373_v54, %v628_v28  ;;  %v724_v54 = vadd.f32 %v2379_v61, %v631_v31 }
 0x19e   : > { %v814_v51 = vadd.f32 %v2381_v62, %v724_v54 }
 0x19f   : > { %v970_v18 = vpop.f32.mrf.mxu2 }
 0x1a0   : > { %v883_v59 = vpop.f32.mrf.mxu1  ;;  %v2389_v4 = vpop.f32.mrf.mxu0  ;;  %v990_v0 = vadd.f32 %v970_v18, %v900_v53  ;;  %v812_v18 = vadd.f32 %v2369_v50, %v722_v43 }
 0x1a1   : > { %v901_v39 = vadd.f32 %v883_v59, %v811_v37 }
 0x1a3   : > { %v1061_v41 = vpop.f32.mrf.mxu3 }
 0x1a4   : > { %v1081_v1 = vadd.f32 %v1061_v41, %v990_v0  ;;  %v813_v41 = vadd.f32 %v2375_v55, %v723_v29 }
 0x1a7   : > { %v973_v34 = vpop.f32.mrf.mxu2 }
 0x1a8   : > { %v2385_v63 = vpop.f32.mrf.mxu1  ;;  %v1145_v8 = vpop.f32.mrf.mxu0 }
 0x1a9   : > { %v1169_v38 = vadd.f32 %v1145_v8, %v1079_v11  ;;  %v902_v45 = vadd.f32 %v2385_v63, %v812_v18 }
 0x1ab   : > { %v1064_v36 = vpop.f32.mrf.mxu3 }
 0x1af   : > { %v976_v10 = vpop.f32.mrf.mxu2 }
 0x1b0   : > { %v2391_v6 = vpop.f32.mrf.mxu1  ;;  %v1148_v9 = vpop.f32.mrf.mxu0 }
 0x1b1   : > { %v1170_v57 = vadd.f32 %v1148_v9, %v1080_v32  ;;  %v991_v9 = vadd.f32 %v973_v34, %v901_v39  ;;  %v903_v52 = vadd.f32 %v2391_v6, %v813_v41 }
 0x1b3   : > { %v1082_v44 = vadd.f32 %v1064_v36, %v991_v9  ;;  %v1067_v20 = vpop.f32.mrf.mxu3  ;;  %v725_v36 = vadd.f32 %v2387_v3, %v634_v35 }
 0x1b5   : > { %v815_v62 = vadd.f32 %v2389_v4, %v725_v36 }
 0x1b7   : > { %v979_v48 = vpop.f32.mrf.mxu2 }
 0x1b8   : > { %v2393_v12 = vpop.f32.mrf.mxu1  ;;  %v1151_v46 = vpop.f32.mrf.mxu0  ;;  %v993_v32 = vadd.f32 %v979_v48, %v903_v52  ;;  %v1727_v48 = vld [vmem:[%s2102_s23 + $0x10] sm:$0xff] }
 0x1b9   : > { %v1171_v56 = vadd.f32 %v1151_v46, %v1081_v1  ;;  %v904_v58 = vadd.f32 %v2393_v12, %v814_v51 }
 0x1bb   : > { %v1070_v63 = vpop.f32.mrf.mxu3 }
 0x1bc   : > { %v1084_v53 = vadd.f32 %v1070_v63, %v993_v32 }
 0x1bf   : > { %v982_v55 = vpop.f32.mrf.mxu2 }
 0x1c0   : > { %v2396_v15 = vpop.f32.mrf.mxu1  ;;  %v1154_v13 = vpop.f32.mrf.mxu0 }
 0x1c1   : > { %v1172_v59 = vadd.f32 %v1154_v13, %v1082_v44  ;;  %v905_v40 = vadd.f32 %v2396_v15, %v815_v62 }
 0x1c7   : > { %v985_v1 = vpop.f32.mrf.mxu2 }
 0x1c8   : > { %v1235_v26 = vpop.f32.mrf.mxu1  ;;  %v1157_v25 = vpop.f32.mrf.mxu0 }
 0x1c9   : > { %v1259_v42 = vadd.f32 %v1235_v26, %v1169_v38  ;;  %v992_v38 = vadd.f32 %v976_v10, %v902_v45  ;;  %v1726_v45 = vld [vmem:[%s2102_s23 + $0x8] sm:$0xff] }
 0x1cb   : > { %v1271_v27 = vadd.f32 %v2403_v21, %v1259_v42  ;;  %v1083_v42 = vadd.f32 %v1067_v20, %v992_v38  ;;  %v1725_v20 = vld [vmem:[%s2102_s23] sm:$0xff] }
 0x1cd   : > { %v1279_v19 = vmax.f32 %v1271_v27, 0.0  ;;  %v1173_v47 = vadd.f32 %v1157_v25, %v1083_v42 }
 0x1cf   : > { %1601 = vmatmul.msk.f32.vlgmr.msra.gmra.mxu2 %vm369_vm0, %v1279_v19 }
 0x1d0   : > { %v1238_v60 = vpop.f32.mrf.mxu1  ;;  %v1160_v27 = vpop.f32.mrf.mxu0 }
 0x1d1   : > { %v1260_v5 = vadd.f32 %v1238_v60, %v1170_v57  ;;  %v1174_v6 = vadd.f32 %v1160_v27, %v1084_v53  ;;  %v1073_v60 = vpop.f32.mrf.mxu3  ;;  %v1729_v27 = vld [vmem:[%s2102_s23 + $0x20] sm:$0xff] }
 0x1d3   : > { %v1272_v8 = vadd.f32 %v2403_v21, %v1260_v5  ;;  %v994_v5 = vadd.f32 %v982_v55, %v904_v58 }
 0x1d5   : > { %v1280_v2 = vmax.f32 %v1272_v8, 0.0  ;;  %v1085_v13 = vadd.f32 %v1073_v60, %v994_v5 }
 0x1d7   : > { %1602 = vmatmul.msk.f32.gmra.mxu2 %vm369_vm0, %v1280_v2  ;;  %v995_v2 = vadd.f32 %v985_v1, %v905_v40 }
 0x1d8   : > { %v1241_v14 = vpop.f32.mrf.mxu1  ;;  %v1163_v61 = vpop.f32.mrf.mxu0 }
 0x1d9   : > { %v1261_v16 = vadd.f32 %v1241_v14, %v1171_v56  ;;  %v1175_v49 = vadd.f32 %v1163_v61, %v1085_v13  ;;  %v1076_v39 = vpop.f32.mrf.mxu3 }
 0x1da   : > { %v1086_v10 = vadd.f32 %v1076_v39, %v995_v2 }
 0x1db   : > { %v1273_v17 = vadd.f32 %v2403_v21, %v1261_v16 }
 0x1dd   : > { %v1281_v11 = vmax.f32 %v1273_v17, 0.0  ;;  %v1724_v17 = vld [vmem:[%s2518_s6] ss:$0 sm:$0xff] }
 0x1df   : > { %1603 = vmatmul.msk.f32.gmra.mxu2 %vm369_vm0, %v1281_v11 }
 0x1e0   : > { %v1244_v33 = vpop.f32.mrf.mxu1  ;;  %v1166_v3 = vpop.f32.mrf.mxu0 }
 0x1e1   : > { %v1262_v26 = vadd.f32 %v1244_v33, %v1172_v59  ;;  %v1176_v4 = vadd.f32 %v1166_v3, %v1086_v10 }
 0x1e3   : > { %v1274_v50 = vadd.f32 %v2403_v21, %v1262_v26 }
 0x1e5   : > { %v1282_v46 = vmax.f32 %v1274_v50, 0.0 }
 0x1e7   : > { %1604 = vmatmul.msk.f32.gmra.mxu2 %vm369_vm0, %v1282_v46  ;;  %v1728_v46 = vld [vmem:[%s2102_s23 + $0x18] sm:$0xff] }
 0x1e8   : > { %v1247_v30 = vpop.f32.mrf.mxu1 }
 0x1e9   : > { %v1263_v19 = vadd.f32 %v1247_v30, %v1173_v47 }
 0x1eb   : > { %v1275_v34 = vadd.f32 %v2403_v21, %v1263_v19 }
 0x1ed   : > { %v1283_v57 = vmax.f32 %v1275_v34, 0.0 }
 0x1ef   : > { %1605 = vmatmul.msk.f32.gmra.mxu2 %vm369_vm0, %v1283_v57 }
 0x1f0   : > { %v1250_v0 = vpop.f32.mrf.mxu1 }
 0x1f1   : > { %v1264_v7 = vadd.f32 %v1250_v0, %v1174_v6  ;;  %v1730_v6 = vld [vmem:[%s2102_s23 + $0x38] sm:$0xff] }
 0x1f3   : > { %v1276_v8 = vadd.f32 %v2403_v21, %v1264_v7 }
 0x1f5   : > { %v1284_v37 = vmax.f32 %v1276_v8, 0.0 }
 0x1f7   : > { %1606 = vmatmul.msk.f32.gmra.mxu2 %vm369_vm0, %v1284_v37 }
 0x1f8   : > { %v1253_v12 = vpop.f32.mrf.mxu1 }
 0x1f9   : > { %v1265_v22 = vadd.f32 %v1253_v12, %v1175_v49 }
 0x1fb   : > { %v1277_v56 = vadd.f32 %v2403_v21, %v1265_v22 }
 0x1fd   : > { %v1285_v14 = vmax.f32 %v1277_v56, 0.0 }
 0x1ff   : > { %1607 = vmatmul.msk.f32.gmra.mxu2 %vm369_vm0, %v1285_v14 }
 0x200   : > { %v1256_v9 = vpop.f32.mrf.mxu1 }
 0x201   : > { %v1266_v15 = vadd.f32 %v1256_v9, %v1176_v4 }
 0x203   : > { %v1278_v16 = vadd.f32 %v2403_v21, %v1266_v15 }
 0x205   : > { %v1286_v43 = vmax.f32 %v1278_v16, 0.0 }
 0x207   : > { %1608 = vmatmul.msk.f32.gmra.mxu2 %vm369_vm0, %v1286_v43 }
 0x252   : > { %v1340_v18 = vpop.f32.mrf.mxu2 }
 0x253   : > { %v1341_v44 = vadd.f32 %v1724_v17, %v1340_v18 }
 0x255   : > { %v1364_v11 = vadd.f32 %v1725_v20, %v1341_v44 }
 0x257   : > { %v1372_v25 = vmax.f32 %v1364_v11, 0.0 }
 0x259   : > { %1380 = vst.msk [vmem:[%s2453_s22] sm:$0xff] %vm369_vm0, %v1372_v25 }
 0x25a   : > { %v1343_v21 = vpop.f32.mrf.mxu2 }
 0x25b   : > { %v1344_v28 = vadd.f32 %v1724_v17, %v1343_v21 }
 0x25d   : > { %v1365_v59 = vadd.f32 %v1726_v45, %v1344_v28 }
 0x25f   : > { %v1373_v33 = vmax.f32 %v1365_v59, 0.0 }
 0x261   : > { %1381 = vst.msk [vmem:[%s2453_s22 + $0x8] sm:$0xff] %vm369_vm0, %v1373_v33 }
 0x262   : > { %v1346_v38 = vpop.f32.mrf.mxu2 }
 0x263   : > { %v1347_v26 = vadd.f32 %v1724_v17, %v1346_v38 }
 0x265   : > { %v1366_v29 = vadd.f32 %v1727_v48, %v1347_v26 }
 0x267   : > { %v1374_v50 = vmax.f32 %v1366_v29, 0.0 }
 0x269   : > { %1382 = vst.msk [vmem:[%s2453_s22 + $0x10] sm:$0xff] %vm369_vm0, %v1374_v50 }
 0x26a   : > { %v1349_v41 = vpop.f32.mrf.mxu2 }
 0x26b   : > { %v1350_v42 = vadd.f32 %v1724_v17, %v1349_v41 }
 0x26d   : > { %v1367_v31 = vadd.f32 %v1728_v46, %v1350_v42 }
 0x26f   : > { %v1375_v52 = vmax.f32 %v1367_v31, 0.0 }
 0x271   : > { %1383 = vst.msk [vmem:[%s2453_s22 + $0x18] sm:$0xff] %vm369_vm0, %v1375_v52 }
 0x272   : > { %v1352_v63 = vpop.f32.mrf.mxu2 }
 0x273   : > { %v1353_v47 = vadd.f32 %v1724_v17, %v1352_v63 }
 0x275   : > { %v1368_v30 = vadd.f32 %v1729_v27, %v1353_v47 }
 0x277   : > { %v1376_v32 = vmax.f32 %v1368_v30, 0.0 }
 0x279   : > { %1384 = vst.msk [vmem:[%s2453_s22 + $0x20] sm:$0xff] %vm369_vm0, %v1376_v32 }
 0x27a   : > { %v1355_v19 = vpop.f32.mrf.mxu2 }
 0x27b   : > { %v1356_v54 = vadd.f32 %v1724_v17, %v1355_v19 }
 0x27d   : > { %v1369_v34 = vadd.f32 %v1356_v54, %v2127_v23 }
 0x27f   : > { %v1377_v55 = vmax.f32 %v1369_v34, 0.0 }
 0x281   : > { %1385 = vst.msk [vmem:[%s2453_s22 + $0x28] sm:$0xff] %vm369_vm0, %v1377_v55 }
 0x282   : > { %v1358_v51 = vpop.f32.mrf.mxu2 }
 0x283   : > { %v1359_v53 = vadd.f32 %v1724_v17, %v1358_v51 }
 0x285   : > { %v1370_v57 = vadd.f32 %v1359_v53, %v2132_v24 }
 0x287   : > { %v1378_v35 = vmax.f32 %v1370_v57, 0.0 }
 0x289   : > { %1386 = vst.msk [vmem:[%s2453_s22 + $0x30] sm:$0xff] %vm369_vm0, %v1378_v35 }
 0x28a   : > { %v1361_v58 = vpop.f32.mrf.mxu2 }
 0x28b   : > { %v1362_v23 = vadd.f32 %v1724_v17, %v1361_v58 }
 0x28d   : > { %v1371_v60 = vadd.f32 %v1730_v6, %v1362_v23 }
 0x28f   : > { %v1379_v0 = vmax.f32 %v1371_v60, 0.0 }
 0x291   : > { %1387 = vst.msk [vmem:[%s2453_s22 + $0x38] sm:$0xff] %vm369_vm0, %v1379_v0 }
 0x292   : > { %1878 = shalt.err (!%p1875_p10)
}
 0x293   : > { %s1933_s15 = smov 128   ;;  %s1934_s22 = smov 8  }
 0x294   : > { %1654 = dma.vmem_to_hbm [thread:$0]  (%p2066_p3), %s1402_s1, 1024, %s1404_s20, %s1389_s28, %s1933_s15, %s1933_s15, %s1934_s22  }
 0x295 PF: > { %s1418_s29 = sand.u32 1, %s1913_s24   ;;  %p2532_p12 = scmp.ge.s32.totalorder %s1925_s27, 2 }
 0x296   : > { %s1419_s9 = scalar_lea.sflag [#allocation5], %s1418_s29 }
 0x297   : > { %p1671_p13 = pnand %p2532_p12, %p2010_p6 }
 0x299   : > { %p1672_p0 = pneg %p1671_p13 }
 0x29b   : > { %1908 = dma.done.wait (%p1672_p0), %s1419_s9, 1024  }
 0x29c   : > { %1910 = vsyncadd (%p1672_p0), %s1419_s9, 4294966272  ;;  %p22_p5 = scmp.ge.s32.totalorder %s2048_s13, 4   ;;  %s2533_s24 = smov %s1917_s25 }
 0x29d   : > { %s2534_s25 = smov %s1921_s26  ;;  %s2535_s26 = smov %s2062_s17 }
 0x29e   : > { %s2536_s27 = smov %s2048_s13  ;;  %24 = sbr.rel (!%p22_p5) target bundleno = 9 (0x9), region = 115 }
 0x2a3   :  { %1425 = vsyncpa [#allocation4], 1 }
 0x2a4   :  { %1427 = vsyncpa [#allocation4 + $0x1], 1 }
 0x2a5   :  { %1428 = vsyncpa [#allocation7], 1 }
 0x2a6   :  { %1429 = vsyncpa [#allocation10], 1 }
 0x2a7   :  { %1430 = vsyncpa [#allocation5], 1 }
 0x2a8   :  { %1432 = vsyncpa [#allocation5 + $0x1], 1 }

</bundles_post_ra>
